<compile_context>
chip_gen: v7x
topology: tpu7x:2x2x1
jax: 0.10.0
libtpu: 0.0.40
codegen_flags: <defaults>
</compile_context>

<pallas_src>
import math

import jax
import jax.numpy as jnp
from jax.experimental import pallas as pl
from jax.experimental.pallas import tpu as pltpu  # noqa: F401  (TPU backend assumed)


# ----------------------------------------------------------------------------
# Fused Pallas kernel: stacked LSTM over all time steps + final Linear
# ----------------------------------------------------------------------------
def make_fused_lstm_kernel(num_layers):
    """Builds the fused kernel for a `num_layers`-deep stacked LSTM + FC.

    Kernel ref layout (all full-array VMEM blocks, no grid):
      refs[0]                  : x       (T, B, D0)      time-major, padded input
      refs[1 + 2*l]            : W_l     (D_in_l + H, 4H) combined [W_ih; W_hh]
      refs[2 + 2*l]            : b_l     (1, 4H)          combined b_ih + b_hh
      refs[-3], refs[-2]       : W_fc (H, O), b_fc (1, O)
      refs[-1]                 : out     (B, O)
    Gate order follows PyTorch: [i, f, g, o].
    """

    def kernel(*refs):
        x_ref = refs[0]
        layer_refs = refs[1:1 + 2 * num_layers]
        w_fc_ref, b_fc_ref, out_ref = refs[1 + 2 * num_layers:]

        T, B, _ = x_ref.shape
        H = w_fc_ref.shape[0]

        # ---- loop-invariant hoists: load weights / broadcast biases once ----
        ws = [layer_refs[2 * l][...] for l in range(num_layers)]          # (D+H, 4H)
        bs = [jnp.broadcast_to(layer_refs[2 * l + 1][...], (B, 4 * H))
              for l in range(num_layers)]                                 # (B, 4H)

        h = [jnp.zeros((B, H), jnp.float32) for _ in range(num_layers)]
        c = [jnp.zeros((B, H), jnp.float32) for _ in range(num_layers)]

        # ---- fully unrolled time loop (T is small & static) -----------------
        for t in range(T):
            layer_in = x_ref[t]                                # (B, D_in) static index
            for l in range(num_layers):
                xh = jnp.concatenate([layer_in, h[l]], axis=-1)  # (B, D_in + H)
                gates = (jnp.dot(xh, ws[l],
                                 preferred_element_type=jnp.float32) + bs[l])
                i = jax.nn.sigmoid(gates[:, 0 * H:1 * H])
                f = jax.nn.sigmoid(gates[:, 1 * H:2 * H])
                g = jnp.tanh(gates[:, 2 * H:3 * H])
                o = jax.nn.sigmoid(gates[:, 3 * H:4 * H])
                c[l] = f * c[l] + i * g
                h[l] = o * jnp.tanh(c[l])
                layer_in = h[l]

        # ---- final Linear on last hidden state; single HBM write ------------
        out_ref[...] = (jnp.dot(h[-1], w_fc_ref[...],
                                preferred_element_type=jnp.float32)
                        + b_fc_ref[...])

    return kernel


# ----------------------------------------------------------------------------
# Wrapper
# ----------------------------------------------------------------------------
def vanilla_lstm_forward(x_bt1, layer_weights, w_fc, b_fc):
    """Full forward pass.

    x_bt1         : (B, T, 1) float32  (PyTorch batch_first layout)
    layer_weights : list of (W (D_in_pad + H, 4H), b (1, 4H)) per layer, where
                    W = [W_ih; W_hh] with layer-0's W_ih rows zero-padded to H.
    w_fc, b_fc    : (H, O), (1, O)
    returns       : (B, O)
    """
    B, T, _ = x_bt1.shape
    H, O = w_fc.shape
    num_layers = len(layer_weights)
    d0 = layer_weights[0][0].shape[0] - H      # padded layer-0 input width (== H)

    # time-major; zero-pad the feature dim 1 -> d0 (matching zero weight rows).
    x = jnp.transpose(x_bt1, (1, 0, 2))                               # (T, B, 1)
    x = jnp.pad(x, ((0, 0), (0, 0), (0, d0 - x.shape[-1])))           # (T, B, d0)

    args = [x]
    for (w, b) in layer_weights:
        args += [w, b]
    args += [w_fc, b_fc]

    return pl.pallas_call(
        make_fused_lstm_kernel(num_layers),
        out_shape=jax.ShapeDtypeStruct((B, O), jnp.float32),
    )(*args)


# ----------------------------------------------------------------------------
# Pure-JAX reference (PyTorch-style params, for sanity check only)
# ----------------------------------------------------------------------------
def lstm_ref(x_bt1, raw_params, w_fc, b_fc):
    x = jnp.transpose(x_bt1, (1, 0, 2))            # (T, B, D_in)
    out = x
    for (w_ih, w_hh, b_ih, b_hh) in raw_params:
        H = w_hh.shape[0]
        B = out.shape[1]
        b = (b_ih + b_hh)[None, :]

        def step(carry, x_t, w_ih=w_ih, w_hh=w_hh, b=b, H=H):
            h, c = carry
            gates = x_t @ w_ih + h @ w_hh + b
            i = jax.nn.sigmoid(gates[:, :H])
            f = jax.nn.sigmoid(gates[:, H:2 * H])
            g = jnp.tanh(gates[:, 2 * H:3 * H])
            o = jax.nn.sigmoid(gates[:, 3 * H:])
            c = f * c + i * g
            h = o * jnp.tanh(c)
            return (h, c), h

        init = (jnp.zeros((B, H), jnp.float32), jnp.zeros((B, H), jnp.float32))
        _, out = jax.lax.scan(step, init, out)
    return out[-1] @ w_fc + b_fc


# ----------------------------------------------------------------------------
# Main
# ----------------------------------------------------------------------------
if __name__ == "__main__":
    config = dict(hidden_size=32, num_layers=2, output_length=4,
                  model="VanillaLSTM", lstm_state="stateless")
    H = config["hidden_size"]
    L = config["num_layers"]
    O = config["output_length"]
    B, T = 2, 8

    key = jax.random.PRNGKey(0)
    k = 1.0 / math.sqrt(H)

    raw_params = []       # PyTorch-layout params (stored transposed for x @ W)
    layer_weights = []    # kernel layout: combined [W_ih; W_hh] + fused bias
    for layer in range(L):
        d_in = 1 if layer == 0 else H
        key, k1, k2, k3, k4 = jax.random.split(key, 5)
        w_ih = jax.random.uniform(k1, (d_in, 4 * H), jnp.float32, -k, k)
        w_hh = jax.random.uniform(k2, (H, 4 * H), jnp.float32, -k, k)
        b_ih = jax.random.uniform(k3, (4 * H,), jnp.float32, -k, k)
        b_hh = jax.random.uniform(k4, (4 * H,), jnp.float32, -k, k)
        raw_params.append((w_ih, w_hh, b_ih, b_hh))

        # zero-pad layer-0 input rows 1 -> H, then stack [W_ih; W_hh].
        w_ih_pad = jnp.pad(w_ih, ((0, H - d_in), (0, 0)))            # (H, 4H)
        w = jnp.concatenate([w_ih_pad, w_hh], axis=0)                # (2H, 4H)
        b = (b_ih + b_hh)[None, :]                                   # (1, 4H)
        layer_weights.append((w, b))

    key, kf1, kf2, kx = jax.random.split(key, 4)
    w_fc = jax.random.uniform(kf1, (H, O), jnp.float32, -k, k)       # (H, O) = W.T
    b_fc = jax.random.uniform(kf2, (O,), jnp.float32, -k, k)[None, :]

    x = jax.random.normal(kx, (B, T, 1), jnp.float32)

    out = vanilla_lstm_forward(x, layer_weights, w_fc, b_fc)
    out = jax.block_until_ready(out)

    ref = lstm_ref(x, raw_params, w_fc, b_fc)
    assert out.shape == (B, O)
    assert jnp.allclose(out, ref, atol=1e-5, rtol=1e-5), "mismatch vs reference"

    print("KERNEL_OK")
</pallas_src>

<mosaic_0001>
module attributes {stable_mosaic.version = 11 : i64} {
  func.func @kernel(%arg0: memref<8x2x32xf32, #tpu.memory_space<vmem>>, %arg1: memref<64x128xf32, #tpu.memory_space<vmem>>, %arg2: memref<1x128xf32, #tpu.memory_space<vmem>>, %arg3: memref<64x128xf32, #tpu.memory_space<vmem>>, %arg4: memref<1x128xf32, #tpu.memory_space<vmem>>, %arg5: memref<32x4xf32, #tpu.memory_space<vmem>>, %arg6: memref<1x4xf32, #tpu.memory_space<vmem>>, %arg7: memref<2x4xf32, #tpu.memory_space<vmem>>) attributes {dimension_semantics = [], scalar_prefetch = 0 : i64, scratch_operands = 0 : i64, tpu.core_type = #tpu.core_type<tc>} {
    %c0 = arith.constant 0 : index
    %c0_0 = arith.constant 0 : index
    %0 = vector.load %arg1[%c0, %c0_0] : memref<64x128xf32, #tpu.memory_space<vmem>>, vector<64x128xf32>
    %c0_1 = arith.constant 0 : index
    %c0_2 = arith.constant 0 : index
    %1 = vector.load %arg3[%c0_1, %c0_2] : memref<64x128xf32, #tpu.memory_space<vmem>>, vector<64x128xf32>
    %c0_3 = arith.constant 0 : index
    %c0_4 = arith.constant 0 : index
    %2 = vector.load %arg2[%c0_3, %c0_4] : memref<1x128xf32, #tpu.memory_space<vmem>>, vector<1x128xf32>
    %3 = vector.shape_cast %2 : vector<1x128xf32> to vector<1x128xf32>
    %4 = vector.broadcast %3 : vector<1x128xf32> to vector<2x128xf32>
    %c0_5 = arith.constant 0 : index
    %c0_6 = arith.constant 0 : index
    %5 = vector.load %arg4[%c0_5, %c0_6] : memref<1x128xf32, #tpu.memory_space<vmem>>, vector<1x128xf32>
    %6 = vector.shape_cast %5 : vector<1x128xf32> to vector<1x128xf32>
    %7 = vector.broadcast %6 : vector<1x128xf32> to vector<2x128xf32>
    %cst = arith.constant 0.000000e+00 : f32
    %8 = vector.broadcast %cst : f32 to vector<2x32xf32>
    %cst_7 = arith.constant 0.000000e+00 : f32
    %9 = vector.broadcast %cst_7 : f32 to vector<2x32xf32>
    %cst_8 = arith.constant 0.000000e+00 : f32
    %10 = vector.broadcast %cst_8 : f32 to vector<2x32xf32>
    %cst_9 = arith.constant 0.000000e+00 : f32
    %11 = vector.broadcast %cst_9 : f32 to vector<2x32xf32>
    %c0_10 = arith.constant 0 : index
    %c0_11 = arith.constant 0 : index
    %c0_12 = arith.constant 0 : index
    %12 = vector.load %arg0[%c0_10, %c0_11, %c0_12] : memref<8x2x32xf32, #tpu.memory_space<vmem>>, vector<1x2x32xf32>
    %13 = vector.shape_cast %12 : vector<1x2x32xf32> to vector<2x32xf32>
    %14 = tpu.concatenate %13, %8 in 1 : vector<2x32xf32>, vector<2x32xf32> -> vector<2x64xf32>
    %cst_13 = arith.constant dense<0.000000e+00> : vector<2x128xf32>
    %15 = tpu.matmul %14, %0, %cst_13 {dimension_numbers = #tpu.dot_dimension_numbers<[1], [0], [0], [1], [0, 0, 1, 1], [], []>} : vector<2x64xf32>, vector<64x128xf32>, vector<2x128xf32> -> vector<2x128xf32>
    %16 = arith.addf %15, %4 : vector<2x128xf32>
    %17 = vector.extract_strided_slice %16 {offsets = [0, 0], sizes = [2, 32], strides = [1, 1]} : vector<2x128xf32> to vector<2x32xf32>
    %18 = arith.negf %17 : vector<2x32xf32>
    %19 = math.exp %18 : vector<2x32xf32>
    %cst_14 = arith.constant 1.000000e+00 : f32
    %20 = vector.broadcast %cst_14 : f32 to vector<2x32xf32>
    %21 = arith.addf %20, %19 : vector<2x32xf32>
    %22 = arith.divf %20, %21 : vector<2x32xf32>
    %23 = vector.extract_strided_slice %16 {offsets = [0, 32], sizes = [2, 32], strides = [1, 1]} : vector<2x128xf32> to vector<2x32xf32>
    %24 = arith.negf %23 : vector<2x32xf32>
    %25 = math.exp %24 : vector<2x32xf32>
    %cst_15 = arith.constant 1.000000e+00 : f32
    %26 = vector.broadcast %cst_15 : f32 to vector<2x32xf32>
    %27 = arith.addf %26, %25 : vector<2x32xf32>
    %28 = arith.divf %26, %27 : vector<2x32xf32>
    %29 = vector.extract_strided_slice %16 {offsets = [0, 64], sizes = [2, 32], strides = [1, 1]} : vector<2x128xf32> to vector<2x32xf32>
    %30 = math.tanh %29 : vector<2x32xf32>
    %31 = vector.extract_strided_slice %16 {offsets = [0, 96], sizes = [2, 32], strides = [1, 1]} : vector<2x128xf32> to vector<2x32xf32>
    %32 = arith.negf %31 : vector<2x32xf32>
    %33 = math.exp %32 : vector<2x32xf32>
    %cst_16 = arith.constant 1.000000e+00 : f32
    %34 = vector.broadcast %cst_16 : f32 to vector<2x32xf32>
    %35 = arith.addf %34, %33 : vector<2x32xf32>
    %36 = arith.divf %34, %35 : vector<2x32xf32>
    %37 = arith.mulf %28, %10 : vector<2x32xf32>
    %38 = arith.mulf %22, %30 : vector<2x32xf32>
    %39 = arith.addf %37, %38 : vector<2x32xf32>
    %40 = math.tanh %39 : vector<2x32xf32>
    %41 = arith.mulf %36, %40 : vector<2x32xf32>
    %42 = tpu.concatenate %41, %9 in 1 : vector<2x32xf32>, vector<2x32xf32> -> vector<2x64xf32>
    %cst_17 = arith.constant dense<0.000000e+00> : vector<2x128xf32>
    %43 = tpu.matmul %42, %1, %cst_17 {dimension_numbers = #tpu.dot_dimension_numbers<[1], [0], [0], [1], [0, 0, 1, 1], [], []>} : vector<2x64xf32>, vector<64x128xf32>, vector<2x128xf32> -> vector<2x128xf32>
    %44 = arith.addf %43, %7 : vector<2x128xf32>
    %45 = vector.extract_strided_slice %44 {offsets = [0, 0], sizes = [2, 32], strides = [1, 1]} : vector<2x128xf32> to vector<2x32xf32>
    %46 = arith.negf %45 : vector<2x32xf32>
    %47 = math.exp %46 : vector<2x32xf32>
    %cst_18 = arith.constant 1.000000e+00 : f32
    %48 = vector.broadcast %cst_18 : f32 to vector<2x32xf32>
    %49 = arith.addf %48, %47 : vector<2x32xf32>
    %50 = arith.divf %48, %49 : vector<2x32xf32>
    %51 = vector.extract_strided_slice %44 {offsets = [0, 32], sizes = [2, 32], strides = [1, 1]} : vector<2x128xf32> to vector<2x32xf32>
    %52 = arith.negf %51 : vector<2x32xf32>
    %53 = math.exp %52 : vector<2x32xf32>
    %cst_19 = arith.constant 1.000000e+00 : f32
    %54 = vector.broadcast %cst_19 : f32 to vector<2x32xf32>
    %55 = arith.addf %54, %53 : vector<2x32xf32>
    %56 = arith.divf %54, %55 : vector<2x32xf32>
    %57 = vector.extract_strided_slice %44 {offsets = [0, 64], sizes = [2, 32], strides = [1, 1]} : vector<2x128xf32> to vector<2x32xf32>
    %58 = math.tanh %57 : vector<2x32xf32>
    %59 = vector.extract_strided_slice %44 {offsets = [0, 96], sizes = [2, 32], strides = [1, 1]} : vector<2x128xf32> to vector<2x32xf32>
    %60 = arith.negf %59 : vector<2x32xf32>
    %61 = math.exp %60 : vector<2x32xf32>
    %cst_20 = arith.constant 1.000000e+00 : f32
    %62 = vector.broadcast %cst_20 : f32 to vector<2x32xf32>
    %63 = arith.addf %62, %61 : vector<2x32xf32>
    %64 = arith.divf %62, %63 : vector<2x32xf32>
    %65 = arith.mulf %56, %11 : vector<2x32xf32>
    %66 = arith.mulf %50, %58 : vector<2x32xf32>
    %67 = arith.addf %65, %66 : vector<2x32xf32>
    %68 = math.tanh %67 : vector<2x32xf32>
    %69 = arith.mulf %64, %68 : vector<2x32xf32>
    %c1 = arith.constant 1 : index
    %c0_21 = arith.constant 0 : index
    %c0_22 = arith.constant 0 : index
    %70 = vector.load %arg0[%c1, %c0_21, %c0_22] : memref<8x2x32xf32, #tpu.memory_space<vmem>>, vector<1x2x32xf32>
    %71 = vector.shape_cast %70 : vector<1x2x32xf32> to vector<2x32xf32>
    %72 = tpu.concatenate %71, %41 in 1 : vector<2x32xf32>, vector<2x32xf32> -> vector<2x64xf32>
    %cst_23 = arith.constant dense<0.000000e+00> : vector<2x128xf32>
    %73 = tpu.matmul %72, %0, %cst_23 {dimension_numbers = #tpu.dot_dimension_numbers<[1], [0], [0], [1], [0, 0, 1, 1], [], []>} : vector<2x64xf32>, vector<64x128xf32>, vector<2x128xf32> -> vector<2x128xf32>
    %74 = arith.addf %73, %4 : vector<2x128xf32>
    %75 = vector.extract_strided_slice %74 {offsets = [0, 0], sizes = [2, 32], strides = [1, 1]} : vector<2x128xf32> to vector<2x32xf32>
    %76 = arith.negf %75 : vector<2x32xf32>
    %77 = math.exp %76 : vector<2x32xf32>
    %cst_24 = arith.constant 1.000000e+00 : f32
    %78 = vector.broadcast %cst_24 : f32 to vector<2x32xf32>
    %79 = arith.addf %78, %77 : vector<2x32xf32>
    %80 = arith.divf %78, %79 : vector<2x32xf32>
    %81 = vector.extract_strided_slice %74 {offsets = [0, 32], sizes = [2, 32], strides = [1, 1]} : vector<2x128xf32> to vector<2x32xf32>
    %82 = arith.negf %81 : vector<2x32xf32>
    %83 = math.exp %82 : vector<2x32xf32>
    %cst_25 = arith.constant 1.000000e+00 : f32
    %84 = vector.broadcast %cst_25 : f32 to vector<2x32xf32>
    %85 = arith.addf %84, %83 : vector<2x32xf32>
    %86 = arith.divf %84, %85 : vector<2x32xf32>
    %87 = vector.extract_strided_slice %74 {offsets = [0, 64], sizes = [2, 32], strides = [1, 1]} : vector<2x128xf32> to vector<2x32xf32>
    %88 = math.tanh %87 : vector<2x32xf32>
    %89 = vector.extract_strided_slice %74 {offsets = [0, 96], sizes = [2, 32], strides = [1, 1]} : vector<2x128xf32> to vector<2x32xf32>
    %90 = arith.negf %89 : vector<2x32xf32>
    %91 = math.exp %90 : vector<2x32xf32>
    %cst_26 = arith.constant 1.000000e+00 : f32
    %92 = vector.broadcast %cst_26 : f32 to vector<2x32xf32>
    %93 = arith.addf %92, %91 : vector<2x32xf32>
    %94 = arith.divf %92, %93 : vector<2x32xf32>
    %95 = arith.mulf %86, %39 : vector<2x32xf32>
    %96 = arith.mulf %80, %88 : vector<2x32xf32>
    %97 = arith.addf %95, %96 : vector<2x32xf32>
    %98 = math.tanh %97 : vector<2x32xf32>
    %99 = arith.mulf %94, %98 : vector<2x32xf32>
    %100 = tpu.concatenate %99, %69 in 1 : vector<2x32xf32>, vector<2x32xf32> -> vector<2x64xf32>
    %cst_27 = arith.constant dense<0.000000e+00> : vector<2x128xf32>
    %101 = tpu.matmul %100, %1, %cst_27 {dimension_numbers = #tpu.dot_dimension_numbers<[1], [0], [0], [1], [0, 0, 1, 1], [], []>} : vector<2x64xf32>, vector<64x128xf32>, vector<2x128xf32> -> vector<2x128xf32>
    %102 = arith.addf %101, %7 : vector<2x128xf32>
    %103 = vector.extract_strided_slice %102 {offsets = [0, 0], sizes = [2, 32], strides = [1, 1]} : vector<2x128xf32> to vector<2x32xf32>
    %104 = arith.negf %103 : vector<2x32xf32>
    %105 = math.exp %104 : vector<2x32xf32>
    %cst_28 = arith.constant 1.000000e+00 : f32
    %106 = vector.broadcast %cst_28 : f32 to vector<2x32xf32>
    %107 = arith.addf %106, %105 : vector<2x32xf32>
    %108 = arith.divf %106, %107 : vector<2x32xf32>
    %109 = vector.extract_strided_slice %102 {offsets = [0, 32], sizes = [2, 32], strides = [1, 1]} : vector<2x128xf32> to vector<2x32xf32>
    %110 = arith.negf %109 : vector<2x32xf32>
    %111 = math.exp %110 : vector<2x32xf32>
    %cst_29 = arith.constant 1.000000e+00 : f32
    %112 = vector.broadcast %cst_29 : f32 to vector<2x32xf32>
    %113 = arith.addf %112, %111 : vector<2x32xf32>
    %114 = arith.divf %112, %113 : vector<2x32xf32>
    %115 = vector.extract_strided_slice %102 {offsets = [0, 64], sizes = [2, 32], strides = [1, 1]} : vector<2x128xf32> to vector<2x32xf32>
    %116 = math.tanh %115 : vector<2x32xf32>
    %117 = vector.extract_strided_slice %102 {offsets = [0, 96], sizes = [2, 32], strides = [1, 1]} : vector<2x128xf32> to vector<2x32xf32>
    %118 = arith.negf %117 : vector<2x32xf32>
    %119 = math.exp %118 : vector<2x32xf32>
    %cst_30 = arith.constant 1.000000e+00 : f32
    %120 = vector.broadcast %cst_30 : f32 to vector<2x32xf32>
    %121 = arith.addf %120, %119 : vector<2x32xf32>
    %122 = arith.divf %120, %121 : vector<2x32xf32>
    %123 = arith.mulf %114, %67 : vector<2x32xf32>
    %124 = arith.mulf %108, %116 : vector<2x32xf32>
    %125 = arith.addf %123, %124 : vector<2x32xf32>
    %126 = math.tanh %125 : vector<2x32xf32>
    %127 = arith.mulf %122, %126 : vector<2x32xf32>
    %c2 = arith.constant 2 : index
    %c0_31 = arith.constant 0 : index
    %c0_32 = arith.constant 0 : index
    %128 = vector.load %arg0[%c2, %c0_31, %c0_32] : memref<8x2x32xf32, #tpu.memory_space<vmem>>, vector<1x2x32xf32>
    %129 = vector.shape_cast %128 : vector<1x2x32xf32> to vector<2x32xf32>
    %130 = tpu.concatenate %129, %99 in 1 : vector<2x32xf32>, vector<2x32xf32> -> vector<2x64xf32>
    %cst_33 = arith.constant dense<0.000000e+00> : vector<2x128xf32>
    %131 = tpu.matmul %130, %0, %cst_33 {dimension_numbers = #tpu.dot_dimension_numbers<[1], [0], [0], [1], [0, 0, 1, 1], [], []>} : vector<2x64xf32>, vector<64x128xf32>, vector<2x128xf32> -> vector<2x128xf32>
    %132 = arith.addf %131, %4 : vector<2x128xf32>
    %133 = vector.extract_strided_slice %132 {offsets = [0, 0], sizes = [2, 32], strides = [1, 1]} : vector<2x128xf32> to vector<2x32xf32>
    %134 = arith.negf %133 : vector<2x32xf32>
    %135 = math.exp %134 : vector<2x32xf32>
    %cst_34 = arith.constant 1.000000e+00 : f32
    %136 = vector.broadcast %cst_34 : f32 to vector<2x32xf32>
    %137 = arith.addf %136, %135 : vector<2x32xf32>
    %138 = arith.divf %136, %137 : vector<2x32xf32>
    %139 = vector.extract_strided_slice %132 {offsets = [0, 32], sizes = [2, 32], strides = [1, 1]} : vector<2x128xf32> to vector<2x32xf32>
    %140 = arith.negf %139 : vector<2x32xf32>
    %141 = math.exp %140 : vector<2x32xf32>
    %cst_35 = arith.constant 1.000000e+00 : f32
    %142 = vector.broadcast %cst_35 : f32 to vector<2x32xf32>
    %143 = arith.addf %142, %141 : vector<2x32xf32>
    %144 = arith.divf %142, %143 : vector<2x32xf32>
    %145 = vector.extract_strided_slice %132 {offsets = [0, 64], sizes = [2, 32], strides = [1, 1]} : vector<2x128xf32> to vector<2x32xf32>
    %146 = math.tanh %145 : vector<2x32xf32>
    %147 = vector.extract_strided_slice %132 {offsets = [0, 96], sizes = [2, 32], strides = [1, 1]} : vector<2x128xf32> to vector<2x32xf32>
    %148 = arith.negf %147 : vector<2x32xf32>
    %149 = math.exp %148 : vector<2x32xf32>
    %cst_36 = arith.constant 1.000000e+00 : f32
    %150 = vector.broadcast %cst_36 : f32 to vector<2x32xf32>
    %151 = arith.addf %150, %149 : vector<2x32xf32>
    %152 = arith.divf %150, %151 : vector<2x32xf32>
    %153 = arith.mulf %144, %97 : vector<2x32xf32>
    %154 = arith.mulf %138, %146 : vector<2x32xf32>
    %155 = arith.addf %153, %154 : vector<2x32xf32>
    %156 = math.tanh %155 : vector<2x32xf32>
    %157 = arith.mulf %152, %156 : vector<2x32xf32>
    %158 = tpu.concatenate %157, %127 in 1 : vector<2x32xf32>, vector<2x32xf32> -> vector<2x64xf32>
    %cst_37 = arith.constant dense<0.000000e+00> : vector<2x128xf32>
    %159 = tpu.matmul %158, %1, %cst_37 {dimension_numbers = #tpu.dot_dimension_numbers<[1], [0], [0], [1], [0, 0, 1, 1], [], []>} : vector<2x64xf32>, vector<64x128xf32>, vector<2x128xf32> -> vector<2x128xf32>
    %160 = arith.addf %159, %7 : vector<2x128xf32>
    %161 = vector.extract_strided_slice %160 {offsets = [0, 0], sizes = [2, 32], strides = [1, 1]} : vector<2x128xf32> to vector<2x32xf32>
    %162 = arith.negf %161 : vector<2x32xf32>
    %163 = math.exp %162 : vector<2x32xf32>
    %cst_38 = arith.constant 1.000000e+00 : f32
    %164 = vector.broadcast %cst_38 : f32 to vector<2x32xf32>
    %165 = arith.addf %164, %163 : vector<2x32xf32>
    %166 = arith.divf %164, %165 : vector<2x32xf32>
    %167 = vector.extract_strided_slice %160 {offsets = [0, 32], sizes = [2, 32], strides = [1, 1]} : vector<2x128xf32> to vector<2x32xf32>
    %168 = arith.negf %167 : vector<2x32xf32>
    %169 = math.exp %168 : vector<2x32xf32>
    %cst_39 = arith.constant 1.000000e+00 : f32
    %170 = vector.broadcast %cst_39 : f32 to vector<2x32xf32>
    %171 = arith.addf %170, %169 : vector<2x32xf32>
    %172 = arith.divf %170, %171 : vector<2x32xf32>
    %173 = vector.extract_strided_slice %160 {offsets = [0, 64], sizes = [2, 32], strides = [1, 1]} : vector<2x128xf32> to vector<2x32xf32>
    %174 = math.tanh %173 : vector<2x32xf32>
    %175 = vector.extract_strided_slice %160 {offsets = [0, 96], sizes = [2, 32], strides = [1, 1]} : vector<2x128xf32> to vector<2x32xf32>
    %176 = arith.negf %175 : vector<2x32xf32>
    %177 = math.exp %176 : vector<2x32xf32>
    %cst_40 = arith.constant 1.000000e+00 : f32
    %178 = vector.broadcast %cst_40 : f32 to vector<2x32xf32>
    %179 = arith.addf %178, %177 : vector<2x32xf32>
    %180 = arith.divf %178, %179 : vector<2x32xf32>
    %181 = arith.mulf %172, %125 : vector<2x32xf32>
    %182 = arith.mulf %166, %174 : vector<2x32xf32>
    %183 = arith.addf %181, %182 : vector<2x32xf32>
    %184 = math.tanh %183 : vector<2x32xf32>
    %185 = arith.mulf %180, %184 : vector<2x32xf32>
    %c3 = arith.constant 3 : index
    %c0_41 = arith.constant 0 : index
    %c0_42 = arith.constant 0 : index
    %186 = vector.load %arg0[%c3, %c0_41, %c0_42] : memref<8x2x32xf32, #tpu.memory_space<vmem>>, vector<1x2x32xf32>
    %187 = vector.shape_cast %186 : vector<1x2x32xf32> to vector<2x32xf32>
    %188 = tpu.concatenate %187, %157 in 1 : vector<2x32xf32>, vector<2x32xf32> -> vector<2x64xf32>
    %cst_43 = arith.constant dense<0.000000e+00> : vector<2x128xf32>
    %189 = tpu.matmul %188, %0, %cst_43 {dimension_numbers = #tpu.dot_dimension_numbers<[1], [0], [0], [1], [0, 0, 1, 1], [], []>} : vector<2x64xf32>, vector<64x128xf32>, vector<2x128xf32> -> vector<2x128xf32>
    %190 = arith.addf %189, %4 : vector<2x128xf32>
    %191 = vector.extract_strided_slice %190 {offsets = [0, 0], sizes = [2, 32], strides = [1, 1]} : vector<2x128xf32> to vector<2x32xf32>
    %192 = arith.negf %191 : vector<2x32xf32>
    %193 = math.exp %192 : vector<2x32xf32>
    %cst_44 = arith.constant 1.000000e+00 : f32
    %194 = vector.broadcast %cst_44 : f32 to vector<2x32xf32>
    %195 = arith.addf %194, %193 : vector<2x32xf32>
    %196 = arith.divf %194, %195 : vector<2x32xf32>
    %197 = vector.extract_strided_slice %190 {offsets = [0, 32], sizes = [2, 32], strides = [1, 1]} : vector<2x128xf32> to vector<2x32xf32>
    %198 = arith.negf %197 : vector<2x32xf32>
    %199 = math.exp %198 : vector<2x32xf32>
    %cst_45 = arith.constant 1.000000e+00 : f32
    %200 = vector.broadcast %cst_45 : f32 to vector<2x32xf32>
    %201 = arith.addf %200, %199 : vector<2x32xf32>
    %202 = arith.divf %200, %201 : vector<2x32xf32>
    %203 = vector.extract_strided_slice %190 {offsets = [0, 64], sizes = [2, 32], strides = [1, 1]} : vector<2x128xf32> to vector<2x32xf32>
    %204 = math.tanh %203 : vector<2x32xf32>
    %205 = vector.extract_strided_slice %190 {offsets = [0, 96], sizes = [2, 32], strides = [1, 1]} : vector<2x128xf32> to vector<2x32xf32>
    %206 = arith.negf %205 : vector<2x32xf32>
    %207 = math.exp %206 : vector<2x32xf32>
    %cst_46 = arith.constant 1.000000e+00 : f32
    %208 = vector.broadcast %cst_46 : f32 to vector<2x32xf32>
    %209 = arith.addf %208, %207 : vector<2x32xf32>
    %210 = arith.divf %208, %209 : vector<2x32xf32>
    %211 = arith.mulf %202, %155 : vector<2x32xf32>
    %212 = arith.mulf %196, %204 : vector<2x32xf32>
    %213 = arith.addf %211, %212 : vector<2x32xf32>
    %214 = math.tanh %213 : vector<2x32xf32>
    %215 = arith.mulf %210, %214 : vector<2x32xf32>
    %216 = tpu.concatenate %215, %185 in 1 : vector<2x32xf32>, vector<2x32xf32> -> vector<2x64xf32>
    %cst_47 = arith.constant dense<0.000000e+00> : vector<2x128xf32>
    %217 = tpu.matmul %216, %1, %cst_47 {dimension_numbers = #tpu.dot_dimension_numbers<[1], [0], [0], [1], [0, 0, 1, 1], [], []>} : vector<2x64xf32>, vector<64x128xf32>, vector<2x128xf32> -> vector<2x128xf32>
    %218 = arith.addf %217, %7 : vector<2x128xf32>
    %219 = vector.extract_strided_slice %218 {offsets = [0, 0], sizes = [2, 32], strides = [1, 1]} : vector<2x128xf32> to vector<2x32xf32>
    %220 = arith.negf %219 : vector<2x32xf32>
    %221 = math.exp %220 : vector<2x32xf32>
    %cst_48 = arith.constant 1.000000e+00 : f32
    %222 = vector.broadcast %cst_48 : f32 to vector<2x32xf32>
    %223 = arith.addf %222, %221 : vector<2x32xf32>
    %224 = arith.divf %222, %223 : vector<2x32xf32>
    %225 = vector.extract_strided_slice %218 {offsets = [0, 32], sizes = [2, 32], strides = [1, 1]} : vector<2x128xf32> to vector<2x32xf32>
    %226 = arith.negf %225 : vector<2x32xf32>
    %227 = math.exp %226 : vector<2x32xf32>
    %cst_49 = arith.constant 1.000000e+00 : f32
    %228 = vector.broadcast %cst_49 : f32 to vector<2x32xf32>
    %229 = arith.addf %228, %227 : vector<2x32xf32>
    %230 = arith.divf %228, %229 : vector<2x32xf32>
    %231 = vector.extract_strided_slice %218 {offsets = [0, 64], sizes = [2, 32], strides = [1, 1]} : vector<2x128xf32> to vector<2x32xf32>
    %232 = math.tanh %231 : vector<2x32xf32>
    %233 = vector.extract_strided_slice %218 {offsets = [0, 96], sizes = [2, 32], strides = [1, 1]} : vector<2x128xf32> to vector<2x32xf32>
    %234 = arith.negf %233 : vector<2x32xf32>
    %235 = math.exp %234 : vector<2x32xf32>
    %cst_50 = arith.constant 1.000000e+00 : f32
    %236 = vector.broadcast %cst_50 : f32 to vector<2x32xf32>
    %237 = arith.addf %236, %235 : vector<2x32xf32>
    %238 = arith.divf %236, %237 : vector<2x32xf32>
    %239 = arith.mulf %230, %183 : vector<2x32xf32>
    %240 = arith.mulf %224, %232 : vector<2x32xf32>
    %241 = arith.addf %239, %240 : vector<2x32xf32>
    %242 = math.tanh %241 : vector<2x32xf32>
    %243 = arith.mulf %238, %242 : vector<2x32xf32>
    %c4 = arith.constant 4 : index
    %c0_51 = arith.constant 0 : index
    %c0_52 = arith.constant 0 : index
    %244 = vector.load %arg0[%c4, %c0_51, %c0_52] : memref<8x2x32xf32, #tpu.memory_space<vmem>>, vector<1x2x32xf32>
    %245 = vector.shape_cast %244 : vector<1x2x32xf32> to vector<2x32xf32>
    %246 = tpu.concatenate %245, %215 in 1 : vector<2x32xf32>, vector<2x32xf32> -> vector<2x64xf32>
    %cst_53 = arith.constant dense<0.000000e+00> : vector<2x128xf32>
    %247 = tpu.matmul %246, %0, %cst_53 {dimension_numbers = #tpu.dot_dimension_numbers<[1], [0], [0], [1], [0, 0, 1, 1], [], []>} : vector<2x64xf32>, vector<64x128xf32>, vector<2x128xf32> -> vector<2x128xf32>
    %248 = arith.addf %247, %4 : vector<2x128xf32>
    %249 = vector.extract_strided_slice %248 {offsets = [0, 0], sizes = [2, 32], strides = [1, 1]} : vector<2x128xf32> to vector<2x32xf32>
    %250 = arith.negf %249 : vector<2x32xf32>
    %251 = math.exp %250 : vector<2x32xf32>
    %cst_54 = arith.constant 1.000000e+00 : f32
    %252 = vector.broadcast %cst_54 : f32 to vector<2x32xf32>
    %253 = arith.addf %252, %251 : vector<2x32xf32>
    %254 = arith.divf %252, %253 : vector<2x32xf32>
    %255 = vector.extract_strided_slice %248 {offsets = [0, 32], sizes = [2, 32], strides = [1, 1]} : vector<2x128xf32> to vector<2x32xf32>
    %256 = arith.negf %255 : vector<2x32xf32>
    %257 = math.exp %256 : vector<2x32xf32>
    %cst_55 = arith.constant 1.000000e+00 : f32
    %258 = vector.broadcast %cst_55 : f32 to vector<2x32xf32>
    %259 = arith.addf %258, %257 : vector<2x32xf32>
    %260 = arith.divf %258, %259 : vector<2x32xf32>
    %261 = vector.extract_strided_slice %248 {offsets = [0, 64], sizes = [2, 32], strides = [1, 1]} : vector<2x128xf32> to vector<2x32xf32>
    %262 = math.tanh %261 : vector<2x32xf32>
    %263 = vector.extract_strided_slice %248 {offsets = [0, 96], sizes = [2, 32], strides = [1, 1]} : vector<2x128xf32> to vector<2x32xf32>
    %264 = arith.negf %263 : vector<2x32xf32>
    %265 = math.exp %264 : vector<2x32xf32>
    %cst_56 = arith.constant 1.000000e+00 : f32
    %266 = vector.broadcast %cst_56 : f32 to vector<2x32xf32>
    %267 = arith.addf %266, %265 : vector<2x32xf32>
    %268 = arith.divf %266, %267 : vector<2x32xf32>
    %269 = arith.mulf %260, %213 : vector<2x32xf32>
    %270 = arith.mulf %254, %262 : vector<2x32xf32>
    %271 = arith.addf %269, %270 : vector<2x32xf32>
    %272 = math.tanh %271 : vector<2x32xf32>
    %273 = arith.mulf %268, %272 : vector<2x32xf32>
    %274 = tpu.concatenate %273, %243 in 1 : vector<2x32xf32>, vector<2x32xf32> -> vector<2x64xf32>
    %cst_57 = arith.constant dense<0.000000e+00> : vector<2x128xf32>
    %275 = tpu.matmul %274, %1, %cst_57 {dimension_numbers = #tpu.dot_dimension_numbers<[1], [0], [0], [1], [0, 0, 1, 1], [], []>} : vector<2x64xf32>, vector<64x128xf32>, vector<2x128xf32> -> vector<2x128xf32>
    %276 = arith.addf %275, %7 : vector<2x128xf32>
    %277 = vector.extract_strided_slice %276 {offsets = [0, 0], sizes = [2, 32], strides = [1, 1]} : vector<2x128xf32> to vector<2x32xf32>
    %278 = arith.negf %277 : vector<2x32xf32>
    %279 = math.exp %278 : vector<2x32xf32>
    %cst_58 = arith.constant 1.000000e+00 : f32
    %280 = vector.broadcast %cst_58 : f32 to vector<2x32xf32>
    %281 = arith.addf %280, %279 : vector<2x32xf32>
    %282 = arith.divf %280, %281 : vector<2x32xf32>
    %283 = vector.extract_strided_slice %276 {offsets = [0, 32], sizes = [2, 32], strides = [1, 1]} : vector<2x128xf32> to vector<2x32xf32>
    %284 = arith.negf %283 : vector<2x32xf32>
    %285 = math.exp %284 : vector<2x32xf32>
    %cst_59 = arith.constant 1.000000e+00 : f32
    %286 = vector.broadcast %cst_59 : f32 to vector<2x32xf32>
    %287 = arith.addf %286, %285 : vector<2x32xf32>
    %288 = arith.divf %286, %287 : vector<2x32xf32>
    %289 = vector.extract_strided_slice %276 {offsets = [0, 64], sizes = [2, 32], strides = [1, 1]} : vector<2x128xf32> to vector<2x32xf32>
    %290 = math.tanh %289 : vector<2x32xf32>
    %291 = vector.extract_strided_slice %276 {offsets = [0, 96], sizes = [2, 32], strides = [1, 1]} : vector<2x128xf32> to vector<2x32xf32>
    %292 = arith.negf %291 : vector<2x32xf32>
    %293 = math.exp %292 : vector<2x32xf32>
    %cst_60 = arith.constant 1.000000e+00 : f32
    %294 = vector.broadcast %cst_60 : f32 to vector<2x32xf32>
    %295 = arith.addf %294, %293 : vector<2x32xf32>
    %296 = arith.divf %294, %295 : vector<2x32xf32>
    %297 = arith.mulf %288, %241 : vector<2x32xf32>
    %298 = arith.mulf %282, %290 : vector<2x32xf32>
    %299 = arith.addf %297, %298 : vector<2x32xf32>
    %300 = math.tanh %299 : vector<2x32xf32>
    %301 = arith.mulf %296, %300 : vector<2x32xf32>
    %c5 = arith.constant 5 : index
    %c0_61 = arith.constant 0 : index
    %c0_62 = arith.constant 0 : index
    %302 = vector.load %arg0[%c5, %c0_61, %c0_62] : memref<8x2x32xf32, #tpu.memory_space<vmem>>, vector<1x2x32xf32>
    %303 = vector.shape_cast %302 : vector<1x2x32xf32> to vector<2x32xf32>
    %304 = tpu.concatenate %303, %273 in 1 : vector<2x32xf32>, vector<2x32xf32> -> vector<2x64xf32>
    %cst_63 = arith.constant dense<0.000000e+00> : vector<2x128xf32>
    %305 = tpu.matmul %304, %0, %cst_63 {dimension_numbers = #tpu.dot_dimension_numbers<[1], [0], [0], [1], [0, 0, 1, 1], [], []>} : vector<2x64xf32>, vector<64x128xf32>, vector<2x128xf32> -> vector<2x128xf32>
    %306 = arith.addf %305, %4 : vector<2x128xf32>
    %307 = vector.extract_strided_slice %306 {offsets = [0, 0], sizes = [2, 32], strides = [1, 1]} : vector<2x128xf32> to vector<2x32xf32>
    %308 = arith.negf %307 : vector<2x32xf32>
    %309 = math.exp %308 : vector<2x32xf32>
    %cst_64 = arith.constant 1.000000e+00 : f32
    %310 = vector.broadcast %cst_64 : f32 to vector<2x32xf32>
    %311 = arith.addf %310, %309 : vector<2x32xf32>
    %312 = arith.divf %310, %311 : vector<2x32xf32>
    %313 = vector.extract_strided_slice %306 {offsets = [0, 32], sizes = [2, 32], strides = [1, 1]} : vector<2x128xf32> to vector<2x32xf32>
    %314 = arith.negf %313 : vector<2x32xf32>
    %315 = math.exp %314 : vector<2x32xf32>
    %cst_65 = arith.constant 1.000000e+00 : f32
    %316 = vector.broadcast %cst_65 : f32 to vector<2x32xf32>
    %317 = arith.addf %316, %315 : vector<2x32xf32>
    %318 = arith.divf %316, %317 : vector<2x32xf32>
    %319 = vector.extract_strided_slice %306 {offsets = [0, 64], sizes = [2, 32], strides = [1, 1]} : vector<2x128xf32> to vector<2x32xf32>
    %320 = math.tanh %319 : vector<2x32xf32>
    %321 = vector.extract_strided_slice %306 {offsets = [0, 96], sizes = [2, 32], strides = [1, 1]} : vector<2x128xf32> to vector<2x32xf32>
    %322 = arith.negf %321 : vector<2x32xf32>
    %323 = math.exp %322 : vector<2x32xf32>
    %cst_66 = arith.constant 1.000000e+00 : f32
    %324 = vector.broadcast %cst_66 : f32 to vector<2x32xf32>
    %325 = arith.addf %324, %323 : vector<2x32xf32>
    %326 = arith.divf %324, %325 : vector<2x32xf32>
    %327 = arith.mulf %318, %271 : vector<2x32xf32>
    %328 = arith.mulf %312, %320 : vector<2x32xf32>
    %329 = arith.addf %327, %328 : vector<2x32xf32>
    %330 = math.tanh %329 : vector<2x32xf32>
    %331 = arith.mulf %326, %330 : vector<2x32xf32>
    %332 = tpu.concatenate %331, %301 in 1 : vector<2x32xf32>, vector<2x32xf32> -> vector<2x64xf32>
    %cst_67 = arith.constant dense<0.000000e+00> : vector<2x128xf32>
    %333 = tpu.matmul %332, %1, %cst_67 {dimension_numbers = #tpu.dot_dimension_numbers<[1], [0], [0], [1], [0, 0, 1, 1], [], []>} : vector<2x64xf32>, vector<64x128xf32>, vector<2x128xf32> -> vector<2x128xf32>
    %334 = arith.addf %333, %7 : vector<2x128xf32>
    %335 = vector.extract_strided_slice %334 {offsets = [0, 0], sizes = [2, 32], strides = [1, 1]} : vector<2x128xf32> to vector<2x32xf32>
    %336 = arith.negf %335 : vector<2x32xf32>
    %337 = math.exp %336 : vector<2x32xf32>
    %cst_68 = arith.constant 1.000000e+00 : f32
    %338 = vector.broadcast %cst_68 : f32 to vector<2x32xf32>
    %339 = arith.addf %338, %337 : vector<2x32xf32>
    %340 = arith.divf %338, %339 : vector<2x32xf32>
    %341 = vector.extract_strided_slice %334 {offsets = [0, 32], sizes = [2, 32], strides = [1, 1]} : vector<2x128xf32> to vector<2x32xf32>
    %342 = arith.negf %341 : vector<2x32xf32>
    %343 = math.exp %342 : vector<2x32xf32>
    %cst_69 = arith.constant 1.000000e+00 : f32
    %344 = vector.broadcast %cst_69 : f32 to vector<2x32xf32>
    %345 = arith.addf %344, %343 : vector<2x32xf32>
    %346 = arith.divf %344, %345 : vector<2x32xf32>
    %347 = vector.extract_strided_slice %334 {offsets = [0, 64], sizes = [2, 32], strides = [1, 1]} : vector<2x128xf32> to vector<2x32xf32>
    %348 = math.tanh %347 : vector<2x32xf32>
    %349 = vector.extract_strided_slice %334 {offsets = [0, 96], sizes = [2, 32], strides = [1, 1]} : vector<2x128xf32> to vector<2x32xf32>
    %350 = arith.negf %349 : vector<2x32xf32>
    %351 = math.exp %350 : vector<2x32xf32>
    %cst_70 = arith.constant 1.000000e+00 : f32
    %352 = vector.broadcast %cst_70 : f32 to vector<2x32xf32>
    %353 = arith.addf %352, %351 : vector<2x32xf32>
    %354 = arith.divf %352, %353 : vector<2x32xf32>
    %355 = arith.mulf %346, %299 : vector<2x32xf32>
    %356 = arith.mulf %340, %348 : vector<2x32xf32>
    %357 = arith.addf %355, %356 : vector<2x32xf32>
    %358 = math.tanh %357 : vector<2x32xf32>
    %359 = arith.mulf %354, %358 : vector<2x32xf32>
    %c6 = arith.constant 6 : index
    %c0_71 = arith.constant 0 : index
    %c0_72 = arith.constant 0 : index
    %360 = vector.load %arg0[%c6, %c0_71, %c0_72] : memref<8x2x32xf32, #tpu.memory_space<vmem>>, vector<1x2x32xf32>
    %361 = vector.shape_cast %360 : vector<1x2x32xf32> to vector<2x32xf32>
    %362 = tpu.concatenate %361, %331 in 1 : vector<2x32xf32>, vector<2x32xf32> -> vector<2x64xf32>
    %cst_73 = arith.constant dense<0.000000e+00> : vector<2x128xf32>
    %363 = tpu.matmul %362, %0, %cst_73 {dimension_numbers = #tpu.dot_dimension_numbers<[1], [0], [0], [1], [0, 0, 1, 1], [], []>} : vector<2x64xf32>, vector<64x128xf32>, vector<2x128xf32> -> vector<2x128xf32>
    %364 = arith.addf %363, %4 : vector<2x128xf32>
    %365 = vector.extract_strided_slice %364 {offsets = [0, 0], sizes = [2, 32], strides = [1, 1]} : vector<2x128xf32> to vector<2x32xf32>
    %366 = arith.negf %365 : vector<2x32xf32>
    %367 = math.exp %366 : vector<2x32xf32>
    %cst_74 = arith.constant 1.000000e+00 : f32
    %368 = vector.broadcast %cst_74 : f32 to vector<2x32xf32>
    %369 = arith.addf %368, %367 : vector<2x32xf32>
    %370 = arith.divf %368, %369 : vector<2x32xf32>
    %371 = vector.extract_strided_slice %364 {offsets = [0, 32], sizes = [2, 32], strides = [1, 1]} : vector<2x128xf32> to vector<2x32xf32>
    %372 = arith.negf %371 : vector<2x32xf32>
    %373 = math.exp %372 : vector<2x32xf32>
    %cst_75 = arith.constant 1.000000e+00 : f32
    %374 = vector.broadcast %cst_75 : f32 to vector<2x32xf32>
    %375 = arith.addf %374, %373 : vector<2x32xf32>
    %376 = arith.divf %374, %375 : vector<2x32xf32>
    %377 = vector.extract_strided_slice %364 {offsets = [0, 64], sizes = [2, 32], strides = [1, 1]} : vector<2x128xf32> to vector<2x32xf32>
    %378 = math.tanh %377 : vector<2x32xf32>
    %379 = vector.extract_strided_slice %364 {offsets = [0, 96], sizes = [2, 32], strides = [1, 1]} : vector<2x128xf32> to vector<2x32xf32>
    %380 = arith.negf %379 : vector<2x32xf32>
    %381 = math.exp %380 : vector<2x32xf32>
    %cst_76 = arith.constant 1.000000e+00 : f32
    %382 = vector.broadcast %cst_76 : f32 to vector<2x32xf32>
    %383 = arith.addf %382, %381 : vector<2x32xf32>
    %384 = arith.divf %382, %383 : vector<2x32xf32>
    %385 = arith.mulf %376, %329 : vector<2x32xf32>
    %386 = arith.mulf %370, %378 : vector<2x32xf32>
    %387 = arith.addf %385, %386 : vector<2x32xf32>
    %388 = math.tanh %387 : vector<2x32xf32>
    %389 = arith.mulf %384, %388 : vector<2x32xf32>
    %390 = tpu.concatenate %389, %359 in 1 : vector<2x32xf32>, vector<2x32xf32> -> vector<2x64xf32>
    %cst_77 = arith.constant dense<0.000000e+00> : vector<2x128xf32>
    %391 = tpu.matmul %390, %1, %cst_77 {dimension_numbers = #tpu.dot_dimension_numbers<[1], [0], [0], [1], [0, 0, 1, 1], [], []>} : vector<2x64xf32>, vector<64x128xf32>, vector<2x128xf32> -> vector<2x128xf32>
    %392 = arith.addf %391, %7 : vector<2x128xf32>
    %393 = vector.extract_strided_slice %392 {offsets = [0, 0], sizes = [2, 32], strides = [1, 1]} : vector<2x128xf32> to vector<2x32xf32>
    %394 = arith.negf %393 : vector<2x32xf32>
    %395 = math.exp %394 : vector<2x32xf32>
    %cst_78 = arith.constant 1.000000e+00 : f32
    %396 = vector.broadcast %cst_78 : f32 to vector<2x32xf32>
    %397 = arith.addf %396, %395 : vector<2x32xf32>
    %398 = arith.divf %396, %397 : vector<2x32xf32>
    %399 = vector.extract_strided_slice %392 {offsets = [0, 32], sizes = [2, 32], strides = [1, 1]} : vector<2x128xf32> to vector<2x32xf32>
    %400 = arith.negf %399 : vector<2x32xf32>
    %401 = math.exp %400 : vector<2x32xf32>
    %cst_79 = arith.constant 1.000000e+00 : f32
    %402 = vector.broadcast %cst_79 : f32 to vector<2x32xf32>
    %403 = arith.addf %402, %401 : vector<2x32xf32>
    %404 = arith.divf %402, %403 : vector<2x32xf32>
    %405 = vector.extract_strided_slice %392 {offsets = [0, 64], sizes = [2, 32], strides = [1, 1]} : vector<2x128xf32> to vector<2x32xf32>
    %406 = math.tanh %405 : vector<2x32xf32>
    %407 = vector.extract_strided_slice %392 {offsets = [0, 96], sizes = [2, 32], strides = [1, 1]} : vector<2x128xf32> to vector<2x32xf32>
    %408 = arith.negf %407 : vector<2x32xf32>
    %409 = math.exp %408 : vector<2x32xf32>
    %cst_80 = arith.constant 1.000000e+00 : f32
    %410 = vector.broadcast %cst_80 : f32 to vector<2x32xf32>
    %411 = arith.addf %410, %409 : vector<2x32xf32>
    %412 = arith.divf %410, %411 : vector<2x32xf32>
    %413 = arith.mulf %404, %357 : vector<2x32xf32>
    %414 = arith.mulf %398, %406 : vector<2x32xf32>
    %415 = arith.addf %413, %414 : vector<2x32xf32>
    %416 = math.tanh %415 : vector<2x32xf32>
    %417 = arith.mulf %412, %416 : vector<2x32xf32>
    %c7 = arith.constant 7 : index
    %c0_81 = arith.constant 0 : index
    %c0_82 = arith.constant 0 : index
    %418 = vector.load %arg0[%c7, %c0_81, %c0_82] : memref<8x2x32xf32, #tpu.memory_space<vmem>>, vector<1x2x32xf32>
    %419 = vector.shape_cast %418 : vector<1x2x32xf32> to vector<2x32xf32>
    %420 = tpu.concatenate %419, %389 in 1 : vector<2x32xf32>, vector<2x32xf32> -> vector<2x64xf32>
    %cst_83 = arith.constant dense<0.000000e+00> : vector<2x128xf32>
    %421 = tpu.matmul %420, %0, %cst_83 {dimension_numbers = #tpu.dot_dimension_numbers<[1], [0], [0], [1], [0, 0, 1, 1], [], []>} : vector<2x64xf32>, vector<64x128xf32>, vector<2x128xf32> -> vector<2x128xf32>
    %422 = arith.addf %421, %4 : vector<2x128xf32>
    %423 = vector.extract_strided_slice %422 {offsets = [0, 0], sizes = [2, 32], strides = [1, 1]} : vector<2x128xf32> to vector<2x32xf32>
    %424 = arith.negf %423 : vector<2x32xf32>
    %425 = math.exp %424 : vector<2x32xf32>
    %cst_84 = arith.constant 1.000000e+00 : f32
    %426 = vector.broadcast %cst_84 : f32 to vector<2x32xf32>
    %427 = arith.addf %426, %425 : vector<2x32xf32>
    %428 = arith.divf %426, %427 : vector<2x32xf32>
    %429 = vector.extract_strided_slice %422 {offsets = [0, 32], sizes = [2, 32], strides = [1, 1]} : vector<2x128xf32> to vector<2x32xf32>
    %430 = arith.negf %429 : vector<2x32xf32>
    %431 = math.exp %430 : vector<2x32xf32>
    %cst_85 = arith.constant 1.000000e+00 : f32
    %432 = vector.broadcast %cst_85 : f32 to vector<2x32xf32>
    %433 = arith.addf %432, %431 : vector<2x32xf32>
    %434 = arith.divf %432, %433 : vector<2x32xf32>
    %435 = vector.extract_strided_slice %422 {offsets = [0, 64], sizes = [2, 32], strides = [1, 1]} : vector<2x128xf32> to vector<2x32xf32>
    %436 = math.tanh %435 : vector<2x32xf32>
    %437 = vector.extract_strided_slice %422 {offsets = [0, 96], sizes = [2, 32], strides = [1, 1]} : vector<2x128xf32> to vector<2x32xf32>
    %438 = arith.negf %437 : vector<2x32xf32>
    %439 = math.exp %438 : vector<2x32xf32>
    %cst_86 = arith.constant 1.000000e+00 : f32
    %440 = vector.broadcast %cst_86 : f32 to vector<2x32xf32>
    %441 = arith.addf %440, %439 : vector<2x32xf32>
    %442 = arith.divf %440, %441 : vector<2x32xf32>
    %443 = arith.mulf %434, %387 : vector<2x32xf32>
    %444 = arith.mulf %428, %436 : vector<2x32xf32>
    %445 = arith.addf %443, %444 : vector<2x32xf32>
    %446 = math.tanh %445 : vector<2x32xf32>
    %447 = arith.mulf %442, %446 : vector<2x32xf32>
    %448 = tpu.concatenate %447, %417 in 1 : vector<2x32xf32>, vector<2x32xf32> -> vector<2x64xf32>
    %cst_87 = arith.constant dense<0.000000e+00> : vector<2x128xf32>
    %449 = tpu.matmul %448, %1, %cst_87 {dimension_numbers = #tpu.dot_dimension_numbers<[1], [0], [0], [1], [0, 0, 1, 1], [], []>} : vector<2x64xf32>, vector<64x128xf32>, vector<2x128xf32> -> vector<2x128xf32>
    %450 = arith.addf %449, %7 : vector<2x128xf32>
    %451 = vector.extract_strided_slice %450 {offsets = [0, 0], sizes = [2, 32], strides = [1, 1]} : vector<2x128xf32> to vector<2x32xf32>
    %452 = arith.negf %451 : vector<2x32xf32>
    %453 = math.exp %452 : vector<2x32xf32>
    %cst_88 = arith.constant 1.000000e+00 : f32
    %454 = vector.broadcast %cst_88 : f32 to vector<2x32xf32>
    %455 = arith.addf %454, %453 : vector<2x32xf32>
    %456 = arith.divf %454, %455 : vector<2x32xf32>
    %457 = vector.extract_strided_slice %450 {offsets = [0, 32], sizes = [2, 32], strides = [1, 1]} : vector<2x128xf32> to vector<2x32xf32>
    %458 = arith.negf %457 : vector<2x32xf32>
    %459 = math.exp %458 : vector<2x32xf32>
    %cst_89 = arith.constant 1.000000e+00 : f32
    %460 = vector.broadcast %cst_89 : f32 to vector<2x32xf32>
    %461 = arith.addf %460, %459 : vector<2x32xf32>
    %462 = arith.divf %460, %461 : vector<2x32xf32>
    %463 = vector.extract_strided_slice %450 {offsets = [0, 64], sizes = [2, 32], strides = [1, 1]} : vector<2x128xf32> to vector<2x32xf32>
    %464 = math.tanh %463 : vector<2x32xf32>
    %465 = vector.extract_strided_slice %450 {offsets = [0, 96], sizes = [2, 32], strides = [1, 1]} : vector<2x128xf32> to vector<2x32xf32>
    %466 = arith.negf %465 : vector<2x32xf32>
    %467 = math.exp %466 : vector<2x32xf32>
    %cst_90 = arith.constant 1.000000e+00 : f32
    %468 = vector.broadcast %cst_90 : f32 to vector<2x32xf32>
    %469 = arith.addf %468, %467 : vector<2x32xf32>
    %470 = arith.divf %468, %469 : vector<2x32xf32>
    %471 = arith.mulf %462, %415 : vector<2x32xf32>
    %472 = arith.mulf %456, %464 : vector<2x32xf32>
    %473 = arith.addf %471, %472 : vector<2x32xf32>
    %474 = math.tanh %473 : vector<2x32xf32>
    %475 = arith.mulf %470, %474 : vector<2x32xf32>
    %c0_91 = arith.constant 0 : index
    %c0_92 = arith.constant 0 : index
    %476 = vector.load %arg5[%c0_91, %c0_92] : memref<32x4xf32, #tpu.memory_space<vmem>>, vector<32x4xf32>
    %cst_93 = arith.constant dense<0.000000e+00> : vector<2x4xf32>
    %477 = tpu.matmul %475, %476, %cst_93 {dimension_numbers = #tpu.dot_dimension_numbers<[1], [0], [0], [1], [0, 0, 1, 1], [], []>} : vector<2x32xf32>, vector<32x4xf32>, vector<2x4xf32> -> vector<2x4xf32>
    %c0_94 = arith.constant 0 : index
    %c0_95 = arith.constant 0 : index
    %478 = vector.load %arg6[%c0_94, %c0_95] : memref<1x4xf32, #tpu.memory_space<vmem>>, vector<1x4xf32>
    %479 = vector.broadcast %478 : vector<1x4xf32> to vector<2x4xf32>
    %480 = arith.addf %477, %479 : vector<2x4xf32>
    %c0_96 = arith.constant 0 : index
    %c0_97 = arith.constant 0 : index
    %481 = vector.load %arg7[%c0_96, %c0_97] : memref<2x4xf32, #tpu.memory_space<vmem>>, vector<2x4xf32>
    tpu.vector_store %arg7[%c0_96, %c0_97], %480 {strides = array<i32>} : memref<2x4xf32, #tpu.memory_space<vmem>>, vector<2x4xf32>,
    return
  }
}

</mosaic_0001>

<bundles_post_ra>
// kernel: tpu_custom_call.1
= control target key start
LH: loop header
LB: loop body
LE: loop exit
PB: predicated region body
PF: predicated region fallthrough
CT: control target
= control target key end

     0   :  { %12 = vsyncpa [#allocation3], 0  ;;  %s3260_s0 = inlined_call_operand.vmem [shape: f32[8,2,32], index: 0, kind: input, shape index: {}]   ;;  %s3261_s1 = inlined_call_operand.hbm [shape: f32[64,128], index: 1, kind: input, shape index: {}]   ;;  %s3262_s2 = inlined_call_operand.vmem [shape: f32[1,128], index: 2, kind: input, shape index: {}]   ;;  %s3263_s3 = inlined_call_operand.hbm [shape: f32[64,128], index: 3, kind: input, shape index: {}]   ;;  %s3264_s4 = inlined_call_operand.vmem [shape: f32[1,128], index: 4, kind: input, shape index: {}]   ;;  %s3265_s5 = inlined_call_operand.vmem [shape: f32[32,4], index: 5, kind: input, shape index: {}]   ;;  %s3266_s6 = inlined_call_operand.vmem [shape: f32[1,4], index: 6, kind: input, shape index: {}]   ;;  %s3267_s7 = inlined_call_operand.hbm [shape: f32[2,4], index: 7, kind: output, shape index: {}]  }
   0x1   :  { %13 = vsyncpa [#allocation6], 0 }
   0x2   :  { %14 = vsyncpa [#allocation4], 0  ;;  %s2771_s24 = smov [#allocation2]   ;;  %s2699_s28 = scalar_lea.hbm %s3261_s1, 1024 }
   0x3   :  { %s22_s25 = sshll.u32 %s2771_s24, 4  ;;  %p2700_p0 = scmp.ne.s32.totalorder %s3261_s1, %s2699_s28  ;;  %s23_s25 = int_to_ptr.vmem [resolvable:$true] %s22_s25 }
   0x4   :  { %p2703_p1 = scmp.lt.u32.totalorder %s2699_s28, %s3261_s1 }
   0x6   :  { %p2705_p2 = pnand %p2703_p1, %p2700_p0 }
   0x8   :  { %2708 = shalt.err (!%p2705_p2)
}
   0x9   :  { %s2709_s10 = scalar_lea.vmem %s23_s25, 1024  ;;  %p2714_p4 = scmp.lt.s32.totalorder %s23_s25, %s23_s25 }
   0xa   :  { %p2710_p3 = scmp.ne.s32.totalorder %s23_s25, %s2709_s10  ;;  %p2715_p5 = scmp.lt.s32.totalorder %s2709_s10, %s2709_s10 }
   0xc   :  { %p2716_p6 = por %p2715_p5, %p2714_p4 }
   0xe   :  { %p2717_p7 = pnand %p2716_p6, %p2710_p3 }
  0x10   :  { %2720 = shalt.err (!%p2717_p7)
}
  0x11   :  { %s2772_s11 = smov 128   ;;  %s2773_s12 = smov 8  }
  0x12   :  { %28 = dma.hbm_to_vmem [thread:$0]  %s3261_s1, 1024, %s23_s25, [#allocation3], %s2772_s11, %s2772_s11, %s2773_s12  }
  0x13   :  { %s2774_s15 = smov [#allocation5]   ;;  %s2721_s19 = scalar_lea.hbm %s3263_s3, 1024 }
  0x14   :  { %s36_s16 = sshll.u32 %s2774_s15, 4  ;;  %p2722_p8 = scmp.ne.s32.totalorder %s3263_s3, %s2721_s19  ;;  %s37_s16 = int_to_ptr.vmem [resolvable:$true] %s36_s16 }
  0x15   :  { %p2725_p9 = scmp.lt.u32.totalorder %s2721_s19, %s3263_s3 }
  0x17   :  { %p2727_p10 = pnand %p2725_p9, %p2722_p8 }
  0x19   :  { %2730 = shalt.err (!%p2727_p10)
}
  0x1a   :  { %s2731_s24 = scalar_lea.vmem %s37_s16, 1024  ;;  %p2736_p12 = scmp.lt.s32.totalorder %s37_s16, %s37_s16 }
  0x1b   :  { %p2732_p11 = scmp.ne.s32.totalorder %s37_s16, %s2731_s24  ;;  %p2737_p13 = scmp.lt.s32.totalorder %s2731_s24, %s2731_s24 }
  0x1d   :  { %p2738_p0 = por %p2737_p13, %p2736_p12 }
  0x1f   :  { %p2739_p1 = pnand %p2738_p0, %p2732_p11 }
  0x21   :  { %2742 = shalt.err (!%p2739_p1)
}
  0x22   :  { %42 = dma.hbm_to_vmem [thread:$0]  %s3263_s3, 1024, %s37_s16, [#allocation6], %s2772_s11, %s2772_s11, %s2773_s12  }
  0x23   :  { %2765 = dma.done.wait [#allocation3], 1024  }
  0x24   :  { %2766 = vsyncadd [#allocation3], 4294966272 }
  0x25   :  { %2767 = dma.done.wait [#allocation6], 1024  }
  0x26   :  { %2768 = vsyncadd [#allocation6], 4294966272  ;;  %v2775_v0 = vmov 0.0|0.0   ;;  %vm2776_vm0 = vmmov 0   ;;  %v2777_v1 = vmov 0.0   ;;  %v55_v2 = vld [vmem:[#allocation2] sm:$0xff] }
  0x27   :  { %2362 = vmatprep.subr.bf16.mxu0 %v2775_v0  ;;  %2063 = vmatprep.mubr.msk.f32.mxu0 %vm2776_vm0, %v2777_v1  ;;  %v56_v3 = vld [vmem:[#allocation2 + $0x8] sm:$0xff]  ;;  %v57_v4 = vld [vmem:[#allocation2 + $0x10] sm:$0xff]  ;;  %v58_v6 = vld [vmem:[#allocation2 + $0x18] sm:$0xff]  ;;  %vm86_vm1 = vcmask 261120   ;;  %vm88_vm2 = vcmask 523264   ;;  %s2778_s29 = smov 64  }
  0x28   :  { %2374 = vmatprep.subr.bf16.mxu1 %v2775_v0  ;;  %2082 = vmatprep.mubr.msk.f32.mxu1 %vm2776_vm0, %v2777_v1  ;;  %v2851_v5 = vpack.c.bf16 %v56_v3, %v55_v2  ;;  %v2854_v7 = vpack.c.bf16 %v58_v6, %v57_v4  ;;  %v59_v8 = vld [vmem:[#allocation2 + $0x20] sm:$0xff]  ;;  %v60_v9 = vld [vmem:[#allocation2 + $0x28] sm:$0xff]  ;;  %v61_v11 = vld [vmem:[#allocation2 + $0x30] sm:$0xff]  ;;  %s2779_s30 = smov 32   ;;  %vm1837_vm3 = vcmask 25600  }
  0x29   :  { %v2858_v10 = vpack.c.bf16 %v60_v9, %v59_v8  ;;  %v62_v12 = vld [vmem:[#allocation2 + $0x38] sm:$0xff]  ;;  %v85_v14 = vld [vmem:[%s3260_s0] sm:$0x3]  ;;  %v64_v31 = vld [vmem:[#allocation5 + $0x8] sm:$0xff] }
  0x2a   :  { %2364 = vmatpush3.bf16.msra.mxu0 %v2851_v5  ;;  %v2862_v13 = vpack.c.bf16 %v62_v12, %v61_v11  ;;  %v87_v15 = vsel %vm86_vm1, %v85_v14, 0.0  ;;  %v2885_v16 = vld [vmem:[%s3262_s2] ss:$0 sm:$0xff]  ;;  %v65_v32 = vld [vmem:[#allocation5 + $0x10] sm:$0xff]  ;;  %v66_v34 = vld [vmem:[#allocation5 + $0x18] sm:$0xff] }
  0x2b   :  { %2365 = vmatprep.subr.bf16.mxu0 %v2775_v0  ;;  %v63_v30 = vld [vmem:[#allocation5] sm:$0xff]  ;;  %v2896_v35 = vpack.c.bf16 %v66_v34, %v65_v32  ;;  %v68_v37 = vld [vmem:[#allocation5 + $0x28] sm:$0xff]  ;;  %v69_v39 = vld [vmem:[#allocation5 + $0x30] sm:$0xff] }
  0x2c   :  { %v2893_v33 = vpack.c.bf16 %v64_v31, %v63_v30  ;;  %v67_v36 = vld [vmem:[#allocation5 + $0x20] sm:$0xff]  ;;  %v70_v40 = vld [vmem:[#allocation5 + $0x38] sm:$0xff] }
  0x2d   :  { %v2900_v38 = vpack.c.bf16 %v68_v37, %v67_v36  ;;  %v2905_v42 = vpack.c.bf16 %v70_v40, %v69_v39  ;;  %v1861_v45 = vld [vmem:[%s3260_s0 + $0x2] sm:$0x3]  ;;  %v2942_v50 = vld [vmem:[%s3264_s4] ss:$0 sm:$0xff] }
  0x2e   :  { %2367 = vmatpush3.bf16.msra.mxu0 %v2854_v7  ;;  %2376 = vmatpush3.bf16.msra.mxu1 %v2893_v33 }
  0x2f   :  { %2368 = vmatprep.subr.bf16.mxu0 %v2775_v0  ;;  %2377 = vmatprep.subr.bf16.mxu1 %v2775_v0 }
  0x32   :  { %2370 = vmatpush3.bf16.msra.mxu0 %v2858_v10  ;;  %2379 = vmatpush3.bf16.msra.mxu1 %v2896_v35 }
  0x33   :  { %2371 = vmatprep.subr.bf16.mxu0 %v2775_v0  ;;  %2380 = vmatprep.subr.bf16.mxu1 %v2775_v0 }
  0x36   :  { %2373 = vmatpush3.bf16.msra.mxu0 %v2862_v13  ;;  %2382 = vmatpush3.bf16.msra.mxu1 %v2900_v38 }
  0x37   :  { %2386 = vmatprep.subr.bf16.mxu0 %v2775_v0  ;;  %2383 = vmatprep.subr.bf16.mxu1 %v2775_v0 }
  0x39   :  { %2064 = vmatmul.mubr.msk.f32.vlgmr.msra.gmra.mrb[0].mxu0 %vm88_vm2, %v87_v15 }
  0x3a   :  { %2388 = vmatpush3.bf16.msra.mxu0 %v2851_v5  ;;  %2101 = vmatprep.mubr.msk.f32.mxu0 %vm2776_vm0, %v2777_v1 }
  0x3b   :  { %2389 = vmatprep.subr.bf16.mxu0 %v2775_v0  ;;  %2385 = vmatpush3.bf16.msra.mxu1 %v2905_v42 }
  0x3c   :  { %2398 = vmatprep.subr.bf16.mxu1 %v2775_v0 }
  0x3e   :  { %2391 = vmatpush3.bf16.msra.mxu0 %v2854_v7 }
  0x3f   :  { %2392 = vmatprep.subr.bf16.mxu0 %v2775_v0 }
  0x42   :  { %2394 = vmatpush3.bf16.msra.mxu0 %v2858_v10 }
  0x43   :  { %2395 = vmatprep.subr.bf16.mxu0 %v2775_v0 }
  0x46   :  { %2397 = vmatpush3.bf16.msra.mxu0 %v2862_v13 }
  0x47   :  { %2410 = vmatprep.subr.bf16.mxu0 %v2775_v0 }
 0x10c   :  { %v158_v17 = vpop.f32.mrb[0].mxu0 }
 0x10d   :  { %v159_v18 = vadd.f32 %v2885_v16, %v158_v17  ;;  %v2065_v19 = vpop.f32.mrb[1].mxu0 }
 0x10f   :  { %2570 = vtanh.f32 %v159_v18  ;;  %v1858_v21 = vmul.f32 -1.442695, %v159_v18 }
 0x111   :  { %2572 = vpow2.f32 %v1858_v21 }
 0x119   :  { %v2571_v20 = vpop.eup %2570 }
 0x11a   :  { %171 = vrot.lane.b32.xlu0 %v2571_v20, %s2778_s29 }
 0x11b   :  { %v2573_v22 = vpop.eup %2572 }
 0x11c   :  { %v165_v23 = vadd.f32 1.0, %v2573_v22 }
 0x11e   :  { %2574 = vrcp.f32 %v165_v23 }
 0x128   :  { %v2575_v24 = vpop.eup %2574 }
 0x129   :  { %v169_v27 = vmul.f32 0.0, %v2575_v24 }
 0x18c   :  { %v172_v25 = vpop.permute.xlu0 %171 }
 0x18d   :  { %v174_v26 = vmul.f32 %v2575_v24, %v172_v25 }
 0x18f   :  { %176 = vrot.lane.b32.xlu0 %v174_v26, %s2779_s30 }
 0x201   :  { %v177_v28 = vpop.permute.xlu0 %176 }
 0x202   :  { %v2890_v29 = vadd.f32 %v177_v28, %v169_v27 }
 0x204   :  { %2576 = vtanh.f32 %v2890_v29 }
 0x20e   :  { %v2577_v41 = vpop.eup %2576 }
 0x20f   :  { %182 = vrot.lane.b32.xlu1 %v2577_v41, %s2778_s29 }
 0x281   :  { %v183_v43 = vpop.permute.xlu1 %182 }
 0x282   :  { %v185_v44 = vmul.f32 %v2575_v24, %v183_v43 }
 0x284   :  { %290 = vrot.lane.b32.xlu0 %v185_v44, %s2778_s29  ;;  %187 = vrot.lane.b32.xlu1 %v185_v44, %s2779_s30 }
 0x2f6   :  { %v291_v46 = vpop.permute.xlu0 %290  ;;  %v188_v47 = vpop.permute.xlu1 %187 }
 0x2f7   :  { %v293_v48 = vsel %vm86_vm1, %v1861_v45, %v291_v46  ;;  %v190_v49 = vsel %vm86_vm1, %v188_v47, 0.0 }
 0x2f8   :  { %2083 = vmatmul.mubr.msk.f32.vlgmr.msra.gmra.mrb[0].mxu1 %vm88_vm2, %v190_v49  ;;  %2102 = vmatmul.mubr.msk.f32.vlgmr.msra.gmra.mrb[2].mxu0 %vm88_vm2, %v293_v48 }
 0x2f9   :  { %2400 = vmatpush3.bf16.msra.mxu1 %v2893_v33  ;;  %2412 = vmatpush3.bf16.msra.mxu0 %v2851_v5 }
 0x2fa   :  { %2401 = vmatprep.subr.bf16.mxu1 %v2775_v0  ;;  %2413 = vmatprep.subr.bf16.mxu0 %v2775_v0 }
 0x2fb   :  { %2120 = vmatprep.mubr.msk.f32.mxu1 %vm2776_vm0, %v2777_v1  ;;  %2139 = vmatprep.mubr.msk.f32.mxu0 %vm2776_vm0, %v2777_v1 }
 0x2fd   :  { %2403 = vmatpush3.bf16.msra.mxu1 %v2896_v35  ;;  %2415 = vmatpush3.bf16.msra.mxu0 %v2854_v7 }
 0x2fe   :  { %2404 = vmatprep.subr.bf16.mxu1 %v2775_v0  ;;  %2416 = vmatprep.subr.bf16.mxu0 %v2775_v0 }
 0x301   :  { %2406 = vmatpush3.bf16.msra.mxu1 %v2900_v38  ;;  %2418 = vmatpush3.bf16.msra.mxu0 %v2858_v10 }
 0x302   :  { %2407 = vmatprep.subr.bf16.mxu1 %v2775_v0  ;;  %2419 = vmatprep.subr.bf16.mxu0 %v2775_v0 }
 0x305   :  { %2409 = vmatpush3.bf16.msra.mxu1 %v2905_v42  ;;  %2421 = vmatpush3.bf16.msra.mxu0 %v2862_v13 }
 0x306   :  { %2422 = vmatprep.subr.bf16.mxu1 %v2775_v0  ;;  %2434 = vmatprep.subr.bf16.mxu0 %v2775_v0 }
 0x3cb   :  { %v260_v51 = vpop.f32.mrb[0].mxu1  ;;  %v363_v52 = vpop.f32.mrb[2].mxu0 }
 0x3cc   :  { %v261_v53 = vadd.f32 %v2942_v50, %v260_v51  ;;  %v364_v54 = vadd.f32 %v2885_v16, %v363_v52  ;;  %v2084_v55 = vpop.f32.mrb[1].mxu1  ;;  %v2103_v56 = vpop.f32.mrb[3].mxu0 }
 0x3ce   :  { %2578 = vtanh.f32 %v261_v53  ;;  %v1860_v59 = vmul.f32 -1.442695, %v261_v53  ;;  %v1863_v60 = vmul.f32 -1.442695, %v364_v54 }
 0x3cf   :  { %2580 = vtanh.f32 %v364_v54 }
 0x3d0   :  { %2582 = vpow2.f32 %v1860_v59 }
 0x3d1   :  { %2584 = vpow2.f32 %v1863_v60 }
 0x3d8   :  { %v2579_v57 = vpop.eup %2578 }
 0x3d9   :  { %v2581_v58 = vpop.eup %2580  ;;  %273 = vrot.lane.b32.xlu1 %v2579_v57, %s2778_s29 }
 0x3da   :  { %376 = vrot.lane.b32.xlu0 %v2581_v58, %s2778_s29  ;;  %v2583_v61 = vpop.eup %2582 }
 0x3db   :  { %v2585_v62 = vpop.eup %2584  ;;  %v267_v63 = vadd.f32 1.0, %v2583_v61 }
 0x3dc   :  { %v370_v2 = vadd.f32 1.0, %v2585_v62 }
 0x3dd   :  { %2586 = vrcp.f32 %v267_v63 }
 0x3de   :  { %2588 = vrcp.f32 %v370_v2 }
 0x3e7   :  { %v2587_v3 = vpop.eup %2586 }
 0x3e8   :  { %v2589_v6 = vpop.eup %2588  ;;  %v271_v12 = vmul.f32 0.0, %v2587_v3 }
 0x3e9   :  { %v374_v15 = vmul.f32 %v2589_v6, %v2890_v29  ;;  %v1866_v29 = vld [vmem:[%s3260_s0 + $0x4] sm:$0x3] }
 0x44b   :  { %v274_v4 = vpop.permute.xlu1 %273 }
 0x44c   :  { %v276_v8 = vmul.f32 %v2587_v3, %v274_v4  ;;  %v377_v9 = vpop.permute.xlu0 %376 }
 0x44d   :  { %v379_v11 = vmul.f32 %v2589_v6, %v377_v9 }
 0x44e   :  { %278 = vrot.lane.b32.xlu1 %v276_v8, %s2779_s30 }
 0x44f   :  { %381 = vrot.lane.b32.xlu0 %v379_v11, %s2779_s30 }
 0x4c0   :  { %v279_v14 = vpop.permute.xlu1 %278 }
 0x4c1   :  { %v2951_v17 = vadd.f32 %v279_v14, %v271_v12  ;;  %v382_v18 = vpop.permute.xlu0 %381  ;;  %v1871_v14 = vld [vmem:[%s3260_s0 + $0x6] sm:$0x3] }
 0x4c2   :  { %v2953_v19 = vadd.f32 %v382_v18, %v374_v15 }
 0x4c3   :  { %2590 = vtanh.f32 %v2951_v17 }
 0x4c4   :  { %2592 = vtanh.f32 %v2953_v19 }
 0x4cd   :  { %v2591_v20 = vpop.eup %2590 }
 0x4ce   :  { %v2593_v21 = vpop.eup %2592  ;;  %284 = vrot.lane.b32.xlu1 %v2591_v20, %s2778_s29 }
 0x4cf   :  { %387 = vrot.lane.b32.xlu0 %v2593_v21, %s2778_s29 }
 0x540   :  { %v285_v22 = vpop.permute.xlu1 %284 }
 0x541   :  { %v287_v23 = vmul.f32 %v2587_v3, %v285_v22  ;;  %v388_v24 = vpop.permute.xlu0 %387 }
 0x542   :  { %v390_v25 = vmul.f32 %v2589_v6, %v388_v24 }
 0x543   :  { %396 = vrot.lane.b32.xlu0 %v287_v23, %s2778_s29 }
 0x544   :  { %392 = vrot.lane.b32.xlu1 %v390_v25, %s2779_s30 }
 0x548   :  { %499 = vrot.lane.b32.xlu1 %v390_v25, %s2778_s29 }
 0x5b5   :  { %v397_v26 = vpop.permute.xlu0 %396 }
 0x5b6   :  { %v393_v27 = vpop.permute.xlu1 %392 }
 0x5b7   :  { %v399_v28 = vsel %vm86_vm1, %v393_v27, %v397_v26 }
 0x5b8   :  { %2121 = vmatmul.mubr.msk.f32.vlgmr.msra.gmra.mrb[2].mxu1 %vm88_vm2, %v399_v28 }
 0x5b9   :  { %2424 = vmatpush3.bf16.msra.mxu1 %v2893_v33  ;;  %2158 = vmatprep.mubr.msk.f32.mxu1 %vm2776_vm0, %v2777_v1 }
 0x5ba   :  { %v500_v30 = vpop.permute.xlu1 %499  ;;  %2425 = vmatprep.subr.bf16.mxu1 %v2775_v0 }
 0x5bb   :  { %v502_v31 = vsel %vm86_vm1, %v1866_v29, %v500_v30 }
 0x5bc   :  { %2140 = vmatmul.mubr.msk.f32.vlgmr.msra.gmra.mrb[4].mxu0 %vm88_vm2, %v502_v31 }
 0x5bd   :  { %2427 = vmatpush3.bf16.msra.mxu1 %v2896_v35  ;;  %2436 = vmatpush3.bf16.msra.mxu0 %v2851_v5 }
 0x5be   :  { %2428 = vmatprep.subr.bf16.mxu1 %v2775_v0  ;;  %2437 = vmatprep.subr.bf16.mxu0 %v2775_v0 }
 0x5bf   :  { %2177 = vmatprep.mubr.msk.f32.mxu0 %vm2776_vm0, %v2777_v1 }
 0x5c1   :  { %2430 = vmatpush3.bf16.msra.mxu1 %v2900_v38  ;;  %2439 = vmatpush3.bf16.msra.mxu0 %v2854_v7 }
 0x5c2   :  { %2431 = vmatprep.subr.bf16.mxu1 %v2775_v0  ;;  %2440 = vmatprep.subr.bf16.mxu0 %v2775_v0 }
 0x5c5   :  { %2433 = vmatpush3.bf16.msra.mxu1 %v2905_v42  ;;  %2442 = vmatpush3.bf16.msra.mxu0 %v2858_v10 }
 0x5c6   :  { %2443 = vmatprep.subr.bf16.mxu0 %v2775_v0  ;;  %2446 = vmatprep.subr.bf16.mxu1 %v2775_v0 }
 0x5c9   :  { %2445 = vmatpush3.bf16.msra.mxu0 %v2862_v13 }
 0x5ca   :  { %2458 = vmatprep.subr.bf16.mxu0 %v2775_v0 }
 0x68b   :  { %v469_v32 = vpop.f32.mrb[2].mxu1 }
 0x68c   :  { %v470_v34 = vadd.f32 %v2942_v50, %v469_v32  ;;  %v2122_v36 = vpop.f32.mrb[3].mxu1 }
 0x68e   :  { %2594 = vtanh.f32 %v470_v34  ;;  %v1865_v44 = vmul.f32 -1.442695, %v470_v34 }
 0x68f   :  { %v572_v37 = vpop.f32.mrb[4].mxu0 }
 0x690   :  { %v573_v39 = vadd.f32 %v2885_v16, %v572_v37  ;;  %v2141_v40 = vpop.f32.mrb[5].mxu0 }
 0x692   :  { %2596 = vtanh.f32 %v573_v39  ;;  %v1868_v45 = vmul.f32 -1.442695, %v573_v39 }
 0x693   :  { %2598 = vpow2.f32 %v1865_v44 }
 0x694   :  { %2600 = vpow2.f32 %v1868_v45 }
 0x698   :  { %v2595_v41 = vpop.eup %2594 }
 0x699   :  { %482 = vrot.lane.b32.xlu0 %v2595_v41, %s2778_s29 }
 0x69c   :  { %v2597_v43 = vpop.eup %2596 }
 0x69d   :  { %585 = vrot.lane.b32.xlu1 %v2597_v43, %s2778_s29  ;;  %v2599_v46 = vpop.eup %2598 }
 0x69e   :  { %v476_v47 = vadd.f32 1.0, %v2599_v46  ;;  %v2601_v48 = vpop.eup %2600 }
 0x69f   :  { %v579_v49 = vadd.f32 1.0, %v2601_v48 }
 0x6a0   :  { %2602 = vrcp.f32 %v476_v47 }
 0x6a1   :  { %2604 = vrcp.f32 %v579_v49 }
 0x6aa   :  { %v2603_v51 = vpop.eup %2602 }
 0x6ab   :  { %v2605_v54 = vpop.eup %2604  ;;  %v480_v57 = vmul.f32 %v2603_v51, %v2951_v17 }
 0x6ac   :  { %v583_v60 = vmul.f32 %v2605_v54, %v2953_v19 }
 0x70b   :  { %v483_v52 = vpop.permute.xlu0 %482 }
 0x70c   :  { %v485_v53 = vmul.f32 %v2603_v51, %v483_v52 }
 0x70e   :  { %487 = vrot.lane.b32.xlu0 %v485_v53, %s2779_s30 }
 0x70f   :  { %v586_v55 = vpop.permute.xlu1 %585 }
 0x710   :  { %v588_v56 = vmul.f32 %v2605_v54, %v586_v55 }
 0x712   :  { %590 = vrot.lane.b32.xlu1 %v588_v56, %s2779_s30 }
 0x780   :  { %v488_v58 = vpop.permute.xlu0 %487 }
 0x781   :  { %v2996_v59 = vadd.f32 %v488_v58, %v480_v57  ;;  %v1876_v58 = vld [vmem:[%s3260_s0 + $0x8] sm:$0x3] }
 0x783   :  { %2606 = vtanh.f32 %v2996_v59 }
 0x784   :  { %v591_v61 = vpop.permute.xlu1 %590 }
 0x785   :  { %v3000_v62 = vadd.f32 %v591_v61, %v583_v60 }
 0x787   :  { %2608 = vtanh.f32 %v3000_v62 }
 0x78d   :  { %v2607_v63 = vpop.eup %2606 }
 0x78e   :  { %493 = vrot.lane.b32.xlu0 %v2607_v63, %s2778_s29 }
 0x791   :  { %v2609_v2 = vpop.eup %2608 }
 0x792   :  { %596 = vrot.lane.b32.xlu1 %v2609_v2, %s2778_s29 }
 0x800   :  { %v494_v3 = vpop.permute.xlu0 %493 }
 0x801   :  { %v496_v4 = vmul.f32 %v2603_v51, %v494_v3 }
 0x803   :  { %605 = vrot.lane.b32.xlu1 %v496_v4, %s2778_s29 }
 0x804   :  { %v597_v6 = vpop.permute.xlu1 %596 }
 0x805   :  { %v599_v8 = vmul.f32 %v2605_v54, %v597_v6 }
 0x807   :  { %601 = vrot.lane.b32.xlu0 %v599_v8, %s2779_s30 }
 0x80b   :  { %708 = vrot.lane.b32.xlu0 %v599_v8, %s2778_s29 }
 0x875   :  { %v606_v9 = vpop.permute.xlu1 %605 }
 0x879   :  { %v602_v11 = vpop.permute.xlu0 %601 }
 0x87a   :  { %v608_v12 = vsel %vm86_vm1, %v602_v11, %v606_v9 }
 0x87b   :  { %2159 = vmatmul.mubr.msk.f32.vlgmr.msra.gmra.mrb[4].mxu1 %vm88_vm2, %v608_v12 }
 0x87c   :  { %2448 = vmatpush3.bf16.msra.mxu1 %v2893_v33  ;;  %2196 = vmatprep.mubr.msk.f32.mxu1 %vm2776_vm0, %v2777_v1 }
 0x87d   :  { %v709_v15 = vpop.permute.xlu0 %708  ;;  %2449 = vmatprep.subr.bf16.mxu1 %v2775_v0 }
 0x87e   :  { %v711_v17 = vsel %vm86_vm1, %v1871_v14, %v709_v15 }
 0x87f   :  { %2178 = vmatmul.mubr.msk.f32.vlgmr.msra.gmra.mrb[6].mxu0 %vm88_vm2, %v711_v17 }
 0x880   :  { %2451 = vmatpush3.bf16.msra.mxu1 %v2896_v35  ;;  %2460 = vmatpush3.bf16.msra.mxu0 %v2851_v5 }
 0x881   :  { %2452 = vmatprep.subr.bf16.mxu1 %v2775_v0  ;;  %2461 = vmatprep.subr.bf16.mxu0 %v2775_v0 }
 0x882   :  { %2215 = vmatprep.mubr.msk.f32.mxu0 %vm2776_vm0, %v2777_v1 }
 0x884   :  { %2454 = vmatpush3.bf16.msra.mxu1 %v2900_v38  ;;  %2463 = vmatpush3.bf16.msra.mxu0 %v2854_v7 }
 0x885   :  { %2455 = vmatprep.subr.bf16.mxu1 %v2775_v0  ;;  %2464 = vmatprep.subr.bf16.mxu0 %v2775_v0 }
 0x888   :  { %2457 = vmatpush3.bf16.msra.mxu1 %v2905_v42  ;;  %2466 = vmatpush3.bf16.msra.mxu0 %v2858_v10 }
 0x889   :  { %2467 = vmatprep.subr.bf16.mxu0 %v2775_v0  ;;  %2470 = vmatprep.subr.bf16.mxu1 %v2775_v0 }
 0x88c   :  { %2469 = vmatpush3.bf16.msra.mxu0 %v2862_v13 }
 0x88d   :  { %2482 = vmatprep.subr.bf16.mxu0 %v2775_v0 }
 0x94e   :  { %v678_v18 = vpop.f32.mrb[4].mxu1 }
 0x94f   :  { %v679_v19 = vadd.f32 %v2942_v50, %v678_v18  ;;  %v2160_v20 = vpop.f32.mrb[5].mxu1 }
 0x951   :  { %2610 = vtanh.f32 %v679_v19  ;;  %v1870_v26 = vmul.f32 -1.442695, %v679_v19 }
 0x952   :  { %v781_v21 = vpop.f32.mrb[6].mxu0 }
 0x953   :  { %v782_v22 = vadd.f32 %v2885_v16, %v781_v21  ;;  %v2179_v23 = vpop.f32.mrb[7].mxu0 }
 0x955   :  { %2612 = vtanh.f32 %v782_v22  ;;  %v1873_v27 = vmul.f32 -1.442695, %v782_v22 }
 0x956   :  { %2614 = vpow2.f32 %v1870_v26 }
 0x957   :  { %2616 = vpow2.f32 %v1873_v27 }
 0x95b   :  { %v2611_v24 = vpop.eup %2610 }
 0x95c   :  { %691 = vrot.lane.b32.xlu1 %v2611_v24, %s2778_s29 }
 0x95f   :  { %v2613_v25 = vpop.eup %2612 }
 0x960   :  { %794 = vrot.lane.b32.xlu0 %v2613_v25, %s2778_s29  ;;  %v2615_v28 = vpop.eup %2614 }
 0x961   :  { %v685_v29 = vadd.f32 1.0, %v2615_v28  ;;  %v2617_v30 = vpop.eup %2616 }
 0x962   :  { %v788_v31 = vadd.f32 1.0, %v2617_v30 }
 0x963   :  { %2618 = vrcp.f32 %v685_v29 }
 0x964   :  { %2620 = vrcp.f32 %v788_v31 }
 0x96d   :  { %v2619_v32 = vpop.eup %2618 }
 0x96e   :  { %v2621_v37 = vpop.eup %2620  ;;  %v689_v41 = vmul.f32 %v2619_v32, %v2996_v59 }
 0x96f   :  { %v792_v45 = vmul.f32 %v2621_v37, %v3000_v62 }
 0x9ce   :  { %v692_v34 = vpop.permute.xlu1 %691 }
 0x9cf   :  { %v694_v36 = vmul.f32 %v2619_v32, %v692_v34 }
 0x9d1   :  { %696 = vrot.lane.b32.xlu1 %v694_v36, %s2779_s30 }
 0x9d2   :  { %v795_v39 = vpop.permute.xlu0 %794 }
 0x9d3   :  { %v797_v40 = vmul.f32 %v2621_v37, %v795_v39 }
 0x9d5   :  { %799 = vrot.lane.b32.xlu0 %v797_v40, %s2779_s30 }
 0xa43   :  { %v697_v43 = vpop.permute.xlu1 %696 }
 0xa44   :  { %v3042_v44 = vadd.f32 %v697_v43, %v689_v41  ;;  %v1881_v43 = vld [vmem:[%s3260_s0 + $0xa] sm:$0x3] }
 0xa46   :  { %2622 = vtanh.f32 %v3042_v44 }
 0xa47   :  { %v800_v46 = vpop.permute.xlu0 %799 }
 0xa48   :  { %v3046_v47 = vadd.f32 %v800_v46, %v792_v45 }
 0xa4a   :  { %2624 = vtanh.f32 %v3046_v47 }
 0xa50   :  { %v2623_v48 = vpop.eup %2622 }
 0xa51   :  { %702 = vrot.lane.b32.xlu1 %v2623_v48, %s2778_s29 }
 0xa54   :  { %v2625_v49 = vpop.eup %2624 }
 0xa55   :  { %805 = vrot.lane.b32.xlu0 %v2625_v49, %s2778_s29 }
 0xac3   :  { %v703_v51 = vpop.permute.xlu1 %702 }
 0xac4   :  { %v705_v52 = vmul.f32 %v2619_v32, %v703_v51 }
 0xac6   :  { %814 = vrot.lane.b32.xlu0 %v705_v52, %s2778_s29 }
 0xac7   :  { %v806_v53 = vpop.permute.xlu0 %805 }
 0xac8   :  { %v808_v54 = vmul.f32 %v2621_v37, %v806_v53 }
 0xaca   :  { %810 = vrot.lane.b32.xlu1 %v808_v54, %s2779_s30 }
 0xace   :  { %917 = vrot.lane.b32.xlu1 %v808_v54, %s2778_s29 }
 0xb38   :  { %v815_v55 = vpop.permute.xlu0 %814 }
 0xb3c   :  { %v811_v56 = vpop.permute.xlu1 %810 }
 0xb3d   :  { %v817_v57 = vsel %vm86_vm1, %v811_v56, %v815_v55 }
 0xb3e   :  { %2197 = vmatmul.mubr.msk.f32.vlgmr.msra.gmra.mrb[6].mxu1 %vm88_vm2, %v817_v57 }
 0xb3f   :  { %2472 = vmatpush3.bf16.msra.mxu1 %v2893_v33  ;;  %2234 = vmatprep.mubr.msk.f32.mxu1 %vm2776_vm0, %v2777_v1 }
 0xb40   :  { %v918_v59 = vpop.permute.xlu1 %917  ;;  %2473 = vmatprep.subr.bf16.mxu1 %v2775_v0 }
 0xb41   :  { %v920_v60 = vsel %vm86_vm1, %v1876_v58, %v918_v59 }
 0xb42   :  { %2216 = vmatmul.mubr.msk.f32.vlgmr.msra.gmra.mrb[8].mxu0 %vm88_vm2, %v920_v60 }
 0xb43   :  { %2475 = vmatpush3.bf16.msra.mxu1 %v2896_v35  ;;  %2484 = vmatpush3.bf16.msra.mxu0 %v2851_v5 }
 0xb44   :  { %2476 = vmatprep.subr.bf16.mxu1 %v2775_v0  ;;  %2485 = vmatprep.subr.bf16.mxu0 %v2775_v0 }
 0xb45   :  { %2253 = vmatprep.mubr.msk.f32.mxu0 %vm2776_vm0, %v2777_v1 }
 0xb47   :  { %2478 = vmatpush3.bf16.msra.mxu1 %v2900_v38  ;;  %2487 = vmatpush3.bf16.msra.mxu0 %v2854_v7 }
 0xb48   :  { %2479 = vmatprep.subr.bf16.mxu1 %v2775_v0  ;;  %2488 = vmatprep.subr.bf16.mxu0 %v2775_v0 }
 0xb4b   :  { %2481 = vmatpush3.bf16.msra.mxu1 %v2905_v42  ;;  %2490 = vmatpush3.bf16.msra.mxu0 %v2858_v10 }
 0xb4c   :  { %2491 = vmatprep.subr.bf16.mxu0 %v2775_v0  ;;  %2494 = vmatprep.subr.bf16.mxu1 %v2775_v0 }
 0xb4f   :  { %2493 = vmatpush3.bf16.msra.mxu0 %v2862_v13 }
 0xb50   :  { %2506 = vmatprep.subr.bf16.mxu0 %v2775_v0 }
 0xc11   :  { %v887_v61 = vpop.f32.mrb[6].mxu1 }
 0xc12   :  { %v888_v62 = vadd.f32 %v2942_v50, %v887_v61  ;;  %v2198_v63 = vpop.f32.mrb[7].mxu1 }
 0xc14   :  { %2626 = vtanh.f32 %v888_v62  ;;  %v1875_v9 = vmul.f32 -1.442695, %v888_v62 }
 0xc15   :  { %v990_v2 = vpop.f32.mrb[8].mxu0 }
 0xc16   :  { %v991_v3 = vadd.f32 %v2885_v16, %v990_v2  ;;  %v2217_v4 = vpop.f32.mrb[9].mxu0 }
 0xc18   :  { %2628 = vtanh.f32 %v991_v3  ;;  %v1878_v11 = vmul.f32 -1.442695, %v991_v3 }
 0xc19   :  { %2630 = vpow2.f32 %v1875_v9 }
 0xc1a   :  { %2632 = vpow2.f32 %v1878_v11 }
 0xc1e   :  { %v2627_v6 = vpop.eup %2626 }
 0xc1f   :  { %900 = vrot.lane.b32.xlu0 %v2627_v6, %s2778_s29 }
 0xc22   :  { %v2629_v8 = vpop.eup %2628 }
 0xc23   :  { %1003 = vrot.lane.b32.xlu1 %v2629_v8, %s2778_s29  ;;  %v2631_v12 = vpop.eup %2630 }
 0xc24   :  { %v894_v14 = vadd.f32 1.0, %v2631_v12  ;;  %v2633_v15 = vpop.eup %2632 }
 0xc25   :  { %v997_v17 = vadd.f32 1.0, %v2633_v15 }
 0xc26   :  { %2634 = vrcp.f32 %v894_v14 }
 0xc27   :  { %2636 = vrcp.f32 %v997_v17 }
 0xc30   :  { %v2635_v18 = vpop.eup %2634 }
 0xc31   :  { %v2637_v21 = vpop.eup %2636  ;;  %v898_v24 = vmul.f32 %v2635_v18, %v3042_v44 }
 0xc32   :  { %v1001_v27 = vmul.f32 %v2637_v21, %v3046_v47 }
 0xc91   :  { %v901_v19 = vpop.permute.xlu0 %900 }
 0xc92   :  { %v903_v20 = vmul.f32 %v2635_v18, %v901_v19 }
 0xc94   :  { %905 = vrot.lane.b32.xlu0 %v903_v20, %s2779_s30 }
 0xc95   :  { %v1004_v22 = vpop.permute.xlu1 %1003 }
 0xc96   :  { %v1006_v23 = vmul.f32 %v2637_v21, %v1004_v22 }
 0xc98   :  { %1008 = vrot.lane.b32.xlu1 %v1006_v23, %s2779_s30 }
 0xd06   :  { %v906_v25 = vpop.permute.xlu0 %905 }
 0xd07   :  { %v3088_v26 = vadd.f32 %v906_v25, %v898_v24  ;;  %v1886_v25 = vld [vmem:[%s3260_s0 + $0xc] sm:$0x3] }
 0xd09   :  { %2638 = vtanh.f32 %v3088_v26 }
 0xd0a   :  { %v1009_v28 = vpop.permute.xlu1 %1008 }
 0xd0b   :  { %v3092_v29 = vadd.f32 %v1009_v28, %v1001_v27 }
 0xd0d   :  { %2640 = vtanh.f32 %v3092_v29 }
 0xd13   :  { %v2639_v30 = vpop.eup %2638 }
 0xd14   :  { %911 = vrot.lane.b32.xlu0 %v2639_v30, %s2778_s29 }
 0xd17   :  { %v2641_v31 = vpop.eup %2640 }
 0xd18   :  { %1014 = vrot.lane.b32.xlu1 %v2641_v31, %s2778_s29 }
 0xd86   :  { %v912_v32 = vpop.permute.xlu0 %911 }
 0xd87   :  { %v914_v34 = vmul.f32 %v2635_v18, %v912_v32 }
 0xd89   :  { %1023 = vrot.lane.b32.xlu1 %v914_v34, %s2778_s29 }
 0xd8a   :  { %v1015_v36 = vpop.permute.xlu1 %1014 }
 0xd8b   :  { %v1017_v37 = vmul.f32 %v2637_v21, %v1015_v36 }
 0xd8d   :  { %1019 = vrot.lane.b32.xlu0 %v1017_v37, %s2779_s30 }
 0xd91   :  { %1126 = vrot.lane.b32.xlu0 %v1017_v37, %s2778_s29 }
 0xdfb   :  { %v1024_v39 = vpop.permute.xlu1 %1023 }
 0xdff   :  { %v1020_v40 = vpop.permute.xlu0 %1019 }
 0xe00   :  { %v1026_v41 = vsel %vm86_vm1, %v1020_v40, %v1024_v39 }
 0xe01   :  { %2235 = vmatmul.mubr.msk.f32.vlgmr.msra.gmra.mrb[8].mxu1 %vm88_vm2, %v1026_v41 }
 0xe02   :  { %2496 = vmatpush3.bf16.msra.mxu1 %v2893_v33  ;;  %2272 = vmatprep.mubr.msk.f32.mxu1 %vm2776_vm0, %v2777_v1 }
 0xe03   :  { %v1127_v44 = vpop.permute.xlu0 %1126  ;;  %2497 = vmatprep.subr.bf16.mxu1 %v2775_v0 }
 0xe04   :  { %v1129_v45 = vsel %vm86_vm1, %v1881_v43, %v1127_v44 }
 0xe05   :  { %2254 = vmatmul.mubr.msk.f32.vlgmr.msra.gmra.mrb[10].mxu0 %vm88_vm2, %v1129_v45 }
 0xe06   :  { %2499 = vmatpush3.bf16.msra.mxu1 %v2896_v35  ;;  %2508 = vmatpush3.bf16.msra.mxu0 %v2851_v5 }
 0xe07   :  { %2500 = vmatprep.subr.bf16.mxu1 %v2775_v0  ;;  %2509 = vmatprep.subr.bf16.mxu0 %v2775_v0 }
 0xe08   :  { %2291 = vmatprep.mubr.msk.f32.mxu0 %vm2776_vm0, %v2777_v1 }
 0xe0a   :  { %2502 = vmatpush3.bf16.msra.mxu1 %v2900_v38  ;;  %2511 = vmatpush3.bf16.msra.mxu0 %v2854_v7 }
 0xe0b   :  { %2503 = vmatprep.subr.bf16.mxu1 %v2775_v0  ;;  %2512 = vmatprep.subr.bf16.mxu0 %v2775_v0 }
 0xe0e   :  { %2505 = vmatpush3.bf16.msra.mxu1 %v2905_v42  ;;  %2514 = vmatpush3.bf16.msra.mxu0 %v2858_v10 }
 0xe0f   :  { %2515 = vmatprep.subr.bf16.mxu0 %v2775_v0  ;;  %2518 = vmatprep.subr.bf16.mxu1 %v2775_v0 }
 0xe12   :  { %2517 = vmatpush3.bf16.msra.mxu0 %v2862_v13 }
 0xe13   :  { %2530 = vmatprep.subr.bf16.mxu0 %v2775_v0 }
 0xed4   :  { %v1096_v46 = vpop.f32.mrb[8].mxu1 }
 0xed5   :  { %v1097_v47 = vadd.f32 %v2942_v50, %v1096_v46  ;;  %v2236_v48 = vpop.f32.mrb[9].mxu1 }
 0xed7   :  { %2642 = vtanh.f32 %v1097_v47  ;;  %v1880_v55 = vmul.f32 -1.442695, %v1097_v47 }
 0xed8   :  { %v1199_v49 = vpop.f32.mrb[10].mxu0 }
 0xed9   :  { %v1200_v51 = vadd.f32 %v2885_v16, %v1199_v49  ;;  %v2255_v52 = vpop.f32.mrb[11].mxu0 }
 0xedb   :  { %2644 = vtanh.f32 %v1200_v51  ;;  %v1883_v56 = vmul.f32 -1.442695, %v1200_v51 }
 0xedc   :  { %2646 = vpow2.f32 %v1880_v55 }
 0xedd   :  { %2648 = vpow2.f32 %v1883_v56 }
 0xee1   :  { %v2643_v53 = vpop.eup %2642 }
 0xee2   :  { %1109 = vrot.lane.b32.xlu1 %v2643_v53, %s2778_s29 }
 0xee5   :  { %v2645_v54 = vpop.eup %2644 }
 0xee6   :  { %1212 = vrot.lane.b32.xlu0 %v2645_v54, %s2778_s29  ;;  %v2647_v57 = vpop.eup %2646 }
 0xee7   :  { %v1103_v58 = vadd.f32 1.0, %v2647_v57  ;;  %v2649_v59 = vpop.eup %2648 }
 0xee8   :  { %v1206_v60 = vadd.f32 1.0, %v2649_v59 }
 0xee9   :  { %2650 = vrcp.f32 %v1103_v58 }
 0xeea   :  { %2652 = vrcp.f32 %v1206_v60 }
 0xef3   :  { %v2651_v61 = vpop.eup %2650 }
 0xef4   :  { %v2653_v2 = vpop.eup %2652  ;;  %v1107_v6 = vmul.f32 %v2651_v61, %v3088_v26 }
 0xef5   :  { %v1210_v11 = vmul.f32 %v2653_v2, %v3092_v29 }
 0xf54   :  { %v1110_v62 = vpop.permute.xlu1 %1109 }
 0xf55   :  { %v1112_v63 = vmul.f32 %v2651_v61, %v1110_v62 }
 0xf57   :  { %1114 = vrot.lane.b32.xlu1 %v1112_v63, %s2779_s30  ;;  %v1891_v63 = vld [vmem:[%s3260_s0 + $0xe] sm:$0x3] }
 0xf58   :  { %v1213_v3 = vpop.permute.xlu0 %1212 }
 0xf59   :  { %v1215_v4 = vmul.f32 %v2653_v2, %v1213_v3 }
 0xf5b   :  { %1217 = vrot.lane.b32.xlu0 %v1215_v4, %s2779_s30 }
 0xfc9   :  { %v1115_v8 = vpop.permute.xlu1 %1114 }
 0xfca   :  { %v3134_v9 = vadd.f32 %v1115_v8, %v1107_v6 }
 0xfcc   :  { %2654 = vtanh.f32 %v3134_v9 }
 0xfcd   :  { %v1218_v12 = vpop.permute.xlu0 %1217 }
 0xfce   :  { %v3138_v14 = vadd.f32 %v1218_v12, %v1210_v11 }
 0xfd0   :  { %2656 = vtanh.f32 %v3138_v14 }
 0xfd6   :  { %v2655_v15 = vpop.eup %2654 }
 0xfd7   :  { %1120 = vrot.lane.b32.xlu1 %v2655_v15, %s2778_s29 }
 0xfda   :  { %v2657_v17 = vpop.eup %2656 }
 0xfdb   :  { %1223 = vrot.lane.b32.xlu0 %v2657_v17, %s2778_s29 }
0x1049   :  { %v1121_v18 = vpop.permute.xlu1 %1120 }
0x104a   :  { %v1123_v19 = vmul.f32 %v2651_v61, %v1121_v18 }
0x104c   :  { %1232 = vrot.lane.b32.xlu0 %v1123_v19, %s2778_s29 }
0x104d   :  { %v1224_v20 = vpop.permute.xlu0 %1223 }
0x104e   :  { %v1226_v21 = vmul.f32 %v2653_v2, %v1224_v20 }
0x1050   :  { %1228 = vrot.lane.b32.xlu1 %v1226_v21, %s2779_s30 }
0x1054   :  { %1335 = vrot.lane.b32.xlu1 %v1226_v21, %s2778_s29 }
0x10be   :  { %v1233_v22 = vpop.permute.xlu0 %1232 }
0x10c2   :  { %v1229_v23 = vpop.permute.xlu1 %1228 }
0x10c3   :  { %v1235_v24 = vsel %vm86_vm1, %v1229_v23, %v1233_v22 }
0x10c4   :  { %2273 = vmatmul.mubr.msk.f32.vlgmr.msra.gmra.mrb[10].mxu1 %vm88_vm2, %v1235_v24 }
0x10c5   :  { %2520 = vmatpush3.bf16.msra.mxu1 %v2893_v33  ;;  %2310 = vmatprep.mubr.msk.f32.mxu1 %vm2776_vm0, %v2777_v1 }
0x10c6   :  { %v1336_v26 = vpop.permute.xlu1 %1335  ;;  %2521 = vmatprep.subr.bf16.mxu1 %v2775_v0 }
0x10c7   :  { %v1338_v27 = vsel %vm86_vm1, %v1886_v25, %v1336_v26 }
0x10c8   :  { %2292 = vmatmul.mubr.msk.f32.vlgmr.msra.gmra.mrb[12].mxu0 %vm88_vm2, %v1338_v27 }
0x10c9   :  { %2523 = vmatpush3.bf16.msra.mxu1 %v2896_v35  ;;  %2532 = vmatpush3.bf16.msra.mxu0 %v2851_v5 }
0x10ca   :  { %2524 = vmatprep.subr.bf16.mxu1 %v2775_v0  ;;  %2533 = vmatprep.subr.bf16.mxu0 %v2775_v0 }
0x10cb   :  { %2329 = vmatprep.mubr.msk.f32.mxu0 %vm2776_vm0, %v2777_v1 }
0x10cd   :  { %2526 = vmatpush3.bf16.msra.mxu1 %v2900_v38  ;;  %2535 = vmatpush3.bf16.msra.mxu0 %v2854_v7 }
0x10ce   :  { %2527 = vmatprep.subr.bf16.mxu1 %v2775_v0  ;;  %2536 = vmatprep.subr.bf16.mxu0 %v2775_v0 }
0x10d1   :  { %2529 = vmatpush3.bf16.msra.mxu1 %v2905_v42  ;;  %2538 = vmatpush3.bf16.msra.mxu0 %v2858_v10 }
0x10d2   :  { %2539 = vmatprep.subr.bf16.mxu0 %v2775_v0  ;;  %2542 = vmatprep.subr.bf16.mxu1 %v2775_v0 }
0x10d5   :  { %2541 = vmatpush3.bf16.msra.mxu0 %v2862_v13 }
0x10d6   :  { %2554 = vmatprep.subr.bf16.mxu0 %v2775_v0 }
0x1197   :  { %v1305_v5 = vpop.f32.mrb[10].mxu1 }
0x1198   :  { %v1306_v28 = vadd.f32 %v2942_v50, %v1305_v5  ;;  %v2274_v7 = vpop.f32.mrb[11].mxu1 }
0x119a   :  { %2658 = vtanh.f32 %v1306_v28  ;;  %v1885_v34 = vmul.f32 -1.442695, %v1306_v28 }
0x119b   :  { %v1408_v29 = vpop.f32.mrb[12].mxu0 }
0x119c   :  { %v1409_v30 = vadd.f32 %v2885_v16, %v1408_v29  ;;  %v2293_v31 = vpop.f32.mrb[13].mxu0 }
0x119e   :  { %2660 = vtanh.f32 %v1409_v30  ;;  %v1888_v13 = vmul.f32 -1.442695, %v1409_v30 }
0x119f   :  { %2662 = vpow2.f32 %v1885_v34 }
0x11a0   :  { %2664 = vpow2.f32 %v1888_v13 }
0x11a4   :  { %v2659_v32 = vpop.eup %2658 }
0x11a5   :  { %1318 = vrot.lane.b32.xlu0 %v2659_v32, %s2778_s29 }
0x11a8   :  { %v2661_v10 = vpop.eup %2660 }
0x11a9   :  { %1421 = vrot.lane.b32.xlu1 %v2661_v10, %s2778_s29  ;;  %v2663_v36 = vpop.eup %2662 }
0x11aa   :  { %v1312_v37 = vadd.f32 1.0, %v2663_v36  ;;  %v2665_v39 = vpop.eup %2664 }
0x11ab   :  { %v1415_v40 = vadd.f32 1.0, %v2665_v39 }
0x11ac   :  { %2666 = vrcp.f32 %v1312_v37 }
0x11ad   :  { %2668 = vrcp.f32 %v1415_v40 }
0x11b6   :  { %v2667_v41 = vpop.eup %2666 }
0x11b7   :  { %v2669_v44 = vpop.eup %2668  ;;  %v1316_v47 = vmul.f32 %v2667_v41, %v3134_v9 }
0x11b8   :  { %v1419_v51 = vmul.f32 %v2669_v44, %v3138_v14 }
0x1217   :  { %v1319_v16 = vpop.permute.xlu0 %1318 }
0x1218   :  { %v1321_v43 = vmul.f32 %v2667_v41, %v1319_v16 }
0x121a   :  { %1323 = vrot.lane.b32.xlu0 %v1321_v43, %s2779_s30 }
0x121b   :  { %v1422_v45 = vpop.permute.xlu1 %1421 }
0x121c   :  { %v1424_v46 = vmul.f32 %v2669_v44, %v1422_v45 }
0x121e   :  { %1426 = vrot.lane.b32.xlu1 %v1424_v46, %s2779_s30 }
0x128c   :  { %v1324_v48 = vpop.permute.xlu0 %1323 }
0x128d   :  { %v3180_v49 = vadd.f32 %v1324_v48, %v1316_v47 }
0x128f   :  { %2670 = vtanh.f32 %v3180_v49 }
0x1290   :  { %v1427_v52 = vpop.permute.xlu1 %1426 }
0x1291   :  { %v3184_v53 = vadd.f32 %v1427_v52, %v1419_v51 }
0x1293   :  { %2672 = vtanh.f32 %v3184_v53 }
0x1299   :  { %v2671_v54 = vpop.eup %2670 }
0x129a   :  { %1329 = vrot.lane.b32.xlu0 %v2671_v54, %s2778_s29  ;;  %v1753_v54 = vld [vmem:[%s3265_s5 + $0x10] sm:$0xff] }
0x129d   :  { %v2673_v55 = vpop.eup %2672 }
0x129e   :  { %1432 = vrot.lane.b32.xlu1 %v2673_v55, %s2778_s29 }
0x130c   :  { %v1330_v56 = vpop.permute.xlu0 %1329 }
0x130d   :  { %v1332_v57 = vmul.f32 %v2667_v41, %v1330_v56  ;;  %v1754_v56 = vld [vmem:[%s3265_s5 + $0x18] sm:$0xff] }
0x130f   :  { %1441 = vrot.lane.b32.xlu1 %v1332_v57, %s2778_s29  ;;  %v2558_v57 = vpack.c.bf16 %v1754_v56, %v1753_v54 }
0x1310   :  { %v1433_v58 = vpop.permute.xlu1 %1432 }
0x1311   :  { %v1435_v59 = vmul.f32 %v2669_v44, %v1433_v58 }
0x1313   :  { %1437 = vrot.lane.b32.xlu0 %v1435_v59, %s2779_s30 }
0x1317   :  { %1544 = vrot.lane.b32.xlu0 %v1435_v59, %s2778_s29 }
0x1381   :  { %v1442_v60 = vpop.permute.xlu1 %1441 }
0x1385   :  { %v1438_v61 = vpop.permute.xlu0 %1437 }
0x1386   :  { %v1444_v62 = vsel %vm86_vm1, %v1438_v61, %v1442_v60 }
0x1387   :  { %2311 = vmatmul.mubr.msk.f32.vlgmr.msra.gmra.mrb[12].mxu1 %vm88_vm2, %v1444_v62  ;;  %v1896_v62 = vld [vmem:[%s3266_s6] ss:$0 sm:$0xff] }
0x1388   :  { %2544 = vmatpush3.bf16.msra.mxu1 %v2893_v33  ;;  %2348 = vmatprep.mubr.msk.f32.mxu1 %vm2776_vm0, %v2777_v1 }
0x1389   :  { %v1545_v2 = vpop.permute.xlu0 %1544  ;;  %2545 = vmatprep.subr.bf16.mxu1 %v2775_v0 }
0x138a   :  { %v1547_v3 = vsel %vm86_vm1, %v1891_v63, %v1545_v2 }
0x138b   :  { %2330 = vmatmul.mubr.msk.f32.vlgmr.msra.gmra.mrb[14].mxu0 %vm88_vm2, %v1547_v3 }
0x138c   :  { %2547 = vmatpush3.bf16.msra.mxu1 %v2896_v35  ;;  %2359 = vmatprep.mubr.msk.f32.mxu0 %vm2776_vm0, %v2777_v1  ;;  %v2698_v35 = vld [vmem:[%s3262_s2] ss:$0 sm:$0xff] }
0x138d   :  { %2548 = vmatprep.subr.bf16.mxu1 %v2775_v0 }
0x1390   :  { %2550 = vmatpush3.bf16.msra.mxu1 %v2900_v38 }
0x1391   :  { %2551 = vmatprep.subr.bf16.mxu1 %v2775_v0 }
0x1394   :  { %2553 = vmatpush3.bf16.msra.mxu1 %v2905_v42 }
0x145a   :  { %v1514_v33 = vpop.f32.mrb[12].mxu1 }
0x145b   :  { %v1515_v4 = vadd.f32 %v2942_v50, %v1514_v33  ;;  %v2312_v6 = vpop.f32.mrb[13].mxu1 }
0x145d   :  { %2674 = vtanh.f32 %v1515_v4  ;;  %v1890_v42 = vmul.f32 -1.442695, %v1515_v4 }
0x145e   :  { %v1617_v8 = vpop.f32.mrb[14].mxu0 }
0x145f   :  { %v1618_v9 = vadd.f32 %v2698_v35, %v1617_v8  ;;  %v2331_v1 = vpop.f32.mrb[15].mxu0 }
0x1461   :  { %2676 = vtanh.f32 %v1618_v9  ;;  %v1893_v12 = vmul.f32 -1.442695, %v1618_v9 }
0x1462   :  { %2678 = vpow2.f32 %v1890_v42 }
0x1463   :  { %2680 = vpow2.f32 %v1893_v12 }
0x1467   :  { %v2675_v11 = vpop.eup %2674 }
0x1468   :  { %1527 = vrot.lane.b32.xlu1 %v2675_v11, %s2778_s29 }
0x146b   :  { %v2677_v38 = vpop.eup %2676 }
0x146c   :  { %1630 = vrot.lane.b32.xlu0 %v2677_v38, %s2778_s29  ;;  %v2679_v14 = vpop.eup %2678 }
0x146d   :  { %v1521_v15 = vadd.f32 1.0, %v2679_v14  ;;  %v2681_v17 = vpop.eup %2680 }
0x146e   :  { %v1624_v18 = vadd.f32 1.0, %v2681_v17 }
0x146f   :  { %2682 = vrcp.f32 %v1521_v15 }
0x1470   :  { %2684 = vrcp.f32 %v1624_v18 }
0x1479   :  { %v2683_v19 = vpop.eup %2682 }
0x147a   :  { %v2685_v22 = vpop.eup %2684  ;;  %v1525_v25 = vmul.f32 %v2683_v19, %v3180_v49 }
0x147b   :  { %v1628_v5 = vmul.f32 %v2685_v22, %v3184_v53  ;;  %v1752_v53 = vld [vmem:[%s3265_s5 + $0x8] sm:$0xff] }
0x14da   :  { %v1528_v20 = vpop.permute.xlu1 %1527 }
0x14db   :  { %v1530_v21 = vmul.f32 %v2683_v19, %v1528_v20 }
0x14dd   :  { %1532 = vrot.lane.b32.xlu1 %v1530_v21, %s2779_s30 }
0x14de   :  { %v1631_v23 = vpop.permute.xlu0 %1630 }
0x14df   :  { %v1633_v24 = vmul.f32 %v2685_v22, %v1631_v23 }
0x14e1   :  { %1635 = vrot.lane.b32.xlu0 %v1633_v24, %s2779_s30 }
0x154f   :  { %v1533_v26 = vpop.permute.xlu1 %1532 }
0x1550   :  { %v1535_v27 = vadd.f32 %v1533_v26, %v1525_v25 }
0x1552   :  { %2686 = vtanh.f32 %v1535_v27 }
0x1553   :  { %v1636_v28 = vpop.permute.xlu0 %1635 }
0x1554   :  { %v1638_v7 = vadd.f32 %v1636_v28, %v1628_v5 }
0x1556   :  { %2688 = vtanh.f32 %v1638_v7 }
0x155c   :  { %v2687_v29 = vpop.eup %2686 }
0x155d   :  { %1538 = vrot.lane.b32.xlu1 %v2687_v29, %s2778_s29 }
0x1560   :  { %v2689_v30 = vpop.eup %2688 }
0x1561   :  { %1641 = vrot.lane.b32.xlu0 %v2689_v30, %s2778_s29 }
0x15cf   :  { %v1539_v31 = vpop.permute.xlu1 %1538 }
0x15d0   :  { %v1541_v32 = vmul.f32 %v2683_v19, %v1539_v31 }
0x15d2   :  { %1650 = vrot.lane.b32.xlu0 %v1541_v32, %s2778_s29 }
0x15d3   :  { %v1642_v10 = vpop.permute.xlu0 %1641 }
0x15d4   :  { %v1644_v34 = vmul.f32 %v2685_v22, %v1642_v10 }
0x15d6   :  { %1646 = vrot.lane.b32.xlu1 %v1644_v34, %s2779_s30 }
0x1644   :  { %v1651_v13 = vpop.permute.xlu0 %1650 }
0x1648   :  { %v1647_v36 = vpop.permute.xlu1 %1646 }
0x1649   :  { %v1653_v37 = vsel %vm86_vm1, %v1647_v36, %v1651_v13 }
0x164a   :  { %2349 = vmatmul.mubr.msk.f32.vlgmr.msra.gmra.mrb[14].mxu1 %vm88_vm2, %v1653_v37 }
0x171d   :  { %v1723_v39 = vpop.f32.mrb[14].mxu1 }
0x171e   :  { %v1724_v40 = vadd.f32 %v2942_v50, %v1723_v39  ;;  %v2350_v41 = vpop.f32.mrb[15].mxu1  ;;  %v1751_v50 = vld [vmem:[%s3265_s5] sm:$0xff]  ;;  %s2780_s5 = smov [#allocation7]  }
0x171f   :  { %v2555_v55 = vpack.c.bf16 %v1752_v53, %v1751_v50  ;;  %s1845_s10 = sshll.u32 %s2780_s5, 4  ;;  %s1846_s10 = int_to_ptr.vmem [resolvable:$true] %s1845_s10 }
0x1720   :  { %2690 = vtanh.f32 %v1724_v40  ;;  %v1895_v43 = vmul.f32 -1.442695, %v1724_v40  ;;  %p2748_p3 = scmp.lt.s32.totalorder %s1846_s10, %s1846_s10 }
0x1721   :  { %2556 = vmatpush3.bf16.msra.mxu0 %v2555_v55 }
0x1722   :  { %2692 = vpow2.f32 %v1895_v43  ;;  %2557 = vmatprep.subr.bf16.mxu0 %v2775_v0 }
0x1725   :  { %2559 = vmatpush3.bf16.msra.mxu0 %v2558_v57 }
0x172a   :  { %v2691_v16 = vpop.eup %2690 }
0x172b   :  { %1736 = vrot.lane.b32.xlu1 %v2691_v16, %s2778_s29 }
0x172c   :  { %v2693_v44 = vpop.eup %2692 }
0x172d   :  { %v1730_v45 = vadd.f32 1.0, %v2693_v44 }
0x172f   :  { %2694 = vrcp.f32 %v1730_v45 }
0x1739   :  { %v2695_v46 = vpop.eup %2694 }
0x173a   :  { %v1734_v49 = vmul.f32 %v2695_v46, %v1535_v27 }
0x179d   :  { %v1737_v47 = vpop.permute.xlu1 %1736 }
0x179e   :  { %v1739_v48 = vmul.f32 %v2695_v46, %v1737_v47 }
0x17a0   :  { %1741 = vrot.lane.b32.xlu0 %v1739_v48, %s2779_s30 }
0x1812   :  { %v1742_v51 = vpop.permute.xlu0 %1741 }
0x1813   :  { %v1744_v52 = vadd.f32 %v1742_v51, %v1734_v49 }
0x1815   :  { %2696 = vtanh.f32 %v1744_v52 }
0x181f   :  { %v2697_v58 = vpop.eup %2696 }
0x1820   :  { %1747 = vrot.lane.b32.xlu1 %v2697_v58, %s2778_s29  ;;  %s2743_s29 = scalar_lea.vmem %s1846_s10, 32 }
0x1821   :  { %p2744_p2 = scmp.ne.s32.totalorder %s1846_s10, %s2743_s29  ;;  %p2749_p4 = scmp.lt.s32.totalorder %s2743_s29, %s2743_s29 }
0x1823   :  { %p2750_p5 = por %p2749_p4, %p2748_p3 }
0x1825   :  { %p2751_p6 = pnand %p2750_p5, %p2744_p2 }
0x1892   :  { %v1748_v59 = vpop.permute.xlu1 %1747 }
0x1893   :  { %v1750_v60 = vmul.f32 %v2695_v46, %v1748_v59 }
0x1895   :  { %1763 = vrot.lane.b32.xlu0 %v1750_v60, %s2779_s30 }
0x1907   :  { %v1764_v61 = vpop.permute.xlu0 %1763 }
0x1908   :  { %2360 = vmatmul.mubr.msk.f32.vlgmr.msra.gmra.mrb[16].mxu0 %vm86_vm1, %v1764_v61 }
0x19db   :  { %v1833_v63 = vpop.f32.mrb[16].mxu0 }
0x19dc   :  { %v1834_v0 = vadd.f32 %v1896_v62, %v1833_v63  ;;  %v2361_v2 = vpop.f32.mrb[17].mxu0 }
0x19de   :  { %1838 = vst.msk [vmem:[#allocation7] sm:$0x3] %vm1837_vm3, %v1834_v0 }
0x19df   :  { %2754 = shalt.err (!%p2751_p6)
}
0x19e0   :  { %s2755_s4 = scalar_lea.hbm %s3267_s7, 32 }
0x19e1   :  { %p2756_p7 = scmp.ne.s32.totalorder %s3267_s7, %s2755_s4  ;;  %p2759_p8 = scmp.lt.u32.totalorder %s2755_s4, %s3267_s7 }
0x19e3   :  { %p2761_p9 = pnand %p2759_p8, %p2756_p7 }
0x19e5   :  { %2764 = shalt.err (!%p2761_p9)
}
0x19e6   :  { %1848 = dma.vmem_to_hbm [thread:$0]  %s1846_s10, 32, %s3267_s7, [#allocation4]  }
0x19e7   :  { %2769 = dma.done.wait [#allocation4], 32  }
0x19e8   :  { %2770 = vsyncadd [#allocation4], 4294967264 }
0x19e9   :  { %1852 = vsyncpa [#allocation3], 1 }
0x19ea   :  { %1853 = vsyncpa [#allocation6], 1 }
0x19eb   :  { %1854 = vsyncpa [#allocation4], 1 }

</bundles_post_ra>
